<compile_context>
chip_gen: v6e
topology: v6e:2x2x1
jax: 0.10.0
libtpu: 0.0.40
codegen_flags: <defaults>
</compile_context>

<pallas_src>
import functools

import numpy as np
import jax
import jax.numpy as jnp
from jax import lax
from jax.experimental import pallas as pl
from jax.experimental.pallas import tpu as pltpu

EPS = 1e-5                     # nn.GroupNorm default eps
_INV_SQRT2 = 0.7071067811865476


def prediction_head_kernel(p1_ref,    # (B, 9*Cin, H*W)  im2col of zero-padded input
                           w1_ref,    # (Cmid, 9*Cin)    conv1 weight, im2col layout
                           b1_ref,    # (Cmid, 1)        conv1 bias
                           g_ref,     # (Cmid, 1)        GroupNorm gamma
                           bt_ref,    # (Cmid, 1)        GroupNorm beta
                           w2_ref,    # (9, Cout, Cmid)  conv2 weight per tap
                           b2_ref,    # (Cout, 1)        conv2 bias
                           m_ref,     # (9, 1, H*W)      border-validity mask per tap
                           o_ref,     # (B, Cout, H*W)   lane-dense output
                           *, H, W):
    B = p1_ref.shape[0]
    Cmid = w1_ref.shape[0]
    Cout = w2_ref.shape[1]
    HW = H * W
    n_elems = float(Cmid * HW)

    w1 = w1_ref[...].astype(jnp.float32)
    b1 = b1_ref[...].astype(jnp.float32)
    gamma = g_ref[...].astype(jnp.float32)
    beta = bt_ref[...].astype(jnp.float32)
    b2 = b2_ref[...].astype(jnp.float32)

    for b in range(B):  # B is small & static; folded into one grid step.
        # ---- conv1: single fused im2col matmul (Cmid, 9*Cin) @ (9*Cin, HW) ----
        patches = p1_ref[b].astype(jnp.float32)
        y = lax.dot_general(w1, patches, (((1,), (0,)), ((), ())),
                            preferred_element_type=jnp.float32)
        y = y + b1                                              # (Cmid, HW)

        # ---- GroupNorm, 1 group: single-pass stats over all of (C, H, W) ----
        s = jnp.sum(y)
        ss = jnp.sum(y * y)
        mean = s / n_elems
        var = jnp.maximum(ss / n_elems - mean * mean, 0.0)
        inv_std = lax.rsqrt(var + EPS)
        yn = (y - mean) * inv_std * gamma + beta

        # ---- GELU (exact erf form; matches nn.GELU default) ----
        yg = 0.5 * yn * (1.0 + lax.erf(yn * jnp.float32(_INV_SQRT2)))

        # ---- conv2: 9 taps via lane rotation + border mask, accumulated in f32 ----
        acc = jnp.zeros((Cout, HW), jnp.float32)
        for ky in range(3):
            for kx in range(3):
                t = ky * 3 + kx
                off = (ky - 1) * W + (kx - 1)
                if off == 0:
                    tap = yg
                else:
                    # tap[c, i] = yg[c, i + off] where valid, 0 at zero-padded borders
                    tap = pltpu.roll(yg, shift=(-off) % HW, axis=1)
                    tap = tap * m_ref[t].astype(jnp.float32)
                wt = w2_ref[t].astype(jnp.float32)              # (Cout, Cmid)
                acc = acc + lax.dot_general(wt, tap, (((1,), (0,)), ((), ())),
                                            preferred_element_type=jnp.float32)

        o_ref[b] = (acc + b2).astype(o_ref.dtype)


def prediction_head(x_nchw, w1_hwio, b1, gamma, beta, w2_hwio, b2):
    """x_nchw: (B, Cin, H, W) f32; conv weights in HWIO.  Returns (B, 2, H, W) f32 (NCHW)."""
    B, Cin, H, W = x_nchw.shape
    Cmid = w1_hwio.shape[3]
    Cout = w2_hwio.shape[3]
    HW = H * W

    # --- wrapper-side plumbing: im2col for conv1 (XLA handles the transposes) ---
    x_pad = jnp.pad(x_nchw, ((0, 0), (0, 0), (1, 1), (1, 1)))
    taps = [x_pad[:, :, ky:ky + H, kx:kx + W]
            for ky in range(3) for kx in range(3)]              # 9 x (B, Cin, H, W)
    p1 = jnp.stack(taps, axis=1).reshape(B, 9 * Cin, HW)        # (B, 9*Cin, HW)

    w1r = jnp.transpose(w1_hwio, (3, 0, 1, 2)).reshape(Cmid, 9 * Cin)  # (Cmid, 9*Cin)
    w2t = jnp.transpose(w2_hwio, (0, 1, 3, 2)).reshape(9, Cout, Cmid)  # (9, Cout, Cmid)
    b1c = b1.reshape(Cmid, 1)
    gc = gamma.reshape(Cmid, 1)
    bc = beta.reshape(Cmid, 1)
    b2c = b2.reshape(Cout, 1)

    # per-tap border-validity masks (static, host-built)
    masks = np.ones((9, H, W), np.float32)
    for ky in range(3):
        for kx in range(3):
            t = ky * 3 + kx
            if ky == 0:
                masks[t, 0, :] = 0.0
            if ky == 2:
                masks[t, H - 1, :] = 0.0
            if kx == 0:
                masks[t, :, 0] = 0.0
            if kx == 2:
                masks[t, :, W - 1] = 0.0
    masks = jnp.asarray(masks.reshape(9, 1, HW))

    kernel = functools.partial(prediction_head_kernel, H=H, W=W)
    vmem = lambda: pl.BlockSpec(memory_space=pltpu.MemorySpace.VMEM)
    out = pl.pallas_call(
        kernel,
        out_shape=jax.ShapeDtypeStruct((B, Cout, HW), jnp.float32),
        in_specs=[vmem() for _ in range(8)],
        out_specs=vmem(),
    )(p1, w1r, b1c, gc, bc, w2t, b2c, masks)

    # TODO(synk): for large B/H/W, reintroduce a grid over B ("parallel" -> both v7x
    # TensorCores) and halo-tile H so per-step blocks stay inside the VMEM budget.
    return out.reshape(B, Cout, H, W)


def reference_forward(x_nhwc, w1, b1, gamma, beta, w2, b2):
    """Pure-JAX reference (NHWC / HWIO), mirroring the PyTorch module semantics."""
    dn = ('NHWC', 'HWIO', 'NHWC')
    y = lax.conv_general_dilated(x_nhwc, w1, (1, 1), 'SAME', dimension_numbers=dn) + b1
    mean = jnp.mean(y, axis=(1, 2, 3), keepdims=True)
    var = jnp.mean((y - mean) ** 2, axis=(1, 2, 3), keepdims=True)
    yn = (y - mean) / jnp.sqrt(var + EPS) * gamma + beta
    yg = 0.5 * yn * (1.0 + lax.erf(yn * jnp.float32(_INV_SQRT2)))
    return lax.conv_general_dilated(yg, w2, (1, 1), 'SAME', dimension_numbers=dn) + b2


if __name__ == "__main__":
    key = jax.random.PRNGKey(0)
    B, Cin, H, W = 2, 8, 16, 16          # PyTorch input is NCHW (2, 8, 16, 16)
    Cmid, Cout = Cin // 2, 2

    k = jax.random.split(key, 8)
    x_nchw = jax.random.normal(k[0], (B, Cin, H, W), jnp.float32)
    w1 = 0.1 * jax.random.normal(k[1], (3, 3, Cin, Cmid), jnp.float32)   # HWIO
    b1 = 0.1 * jax.random.normal(k[2], (Cmid,), jnp.float32)
    gamma = 1.0 + 0.1 * jax.random.normal(k[3], (Cmid,), jnp.float32)
    beta = 0.1 * jax.random.normal(k[4], (Cmid,), jnp.float32)
    w2 = 0.1 * jax.random.normal(k[5], (3, 3, Cmid, Cout), jnp.float32)  # HWIO
    b2 = 0.1 * jax.random.normal(k[6], (Cout,), jnp.float32)

    out = jax.block_until_ready(prediction_head(x_nchw, w1, b1, gamma, beta, w2, b2))

    x_nhwc = jnp.transpose(x_nchw, (0, 2, 3, 1))
    ref_nhwc = jax.block_until_ready(reference_forward(x_nhwc, w1, b1, gamma, beta, w2, b2))
    ref_nchw = jnp.transpose(ref_nhwc, (0, 3, 1, 2))

    assert out.shape == (B, Cout, H, W)
    max_err = jnp.max(jnp.abs(out - ref_nchw))
    assert jnp.allclose(out, ref_nchw, atol=1e-3, rtol=1e-3), f"max abs err {max_err}"

    print("KERNEL_OK")
</pallas_src>

<mosaic_0001>
module attributes {stable_mosaic.version = 11 : i64} {
  func.func @prediction_head_kernel(%arg0: memref<2x72x256xf32, #tpu.memory_space<vmem>>, %arg1: memref<4x72xf32, #tpu.memory_space<vmem>>, %arg2: memref<4x1xf32, #tpu.memory_space<vmem>>, %arg3: memref<4x1xf32, #tpu.memory_space<vmem>>, %arg4: memref<4x1xf32, #tpu.memory_space<vmem>>, %arg5: memref<9x2x4xf32, #tpu.memory_space<vmem>>, %arg6: memref<2x1xf32, #tpu.memory_space<vmem>>, %arg7: memref<9x1x256xf32, #tpu.memory_space<vmem>>, %arg8: memref<2x2x256xf32, #tpu.memory_space<vmem>>) attributes {dimension_semantics = [], scalar_prefetch = 0 : i64, scratch_operands = 0 : i64, tpu.core_type = #tpu.core_type<tc>} {
    %c0 = arith.constant 0 : index
    %c0_0 = arith.constant 0 : index
    %0 = vector.load %arg1[%c0, %c0_0] : memref<4x72xf32, #tpu.memory_space<vmem>>, vector<4x72xf32>
    %c0_1 = arith.constant 0 : index
    %c0_2 = arith.constant 0 : index
    %1 = vector.load %arg2[%c0_1, %c0_2] : memref<4x1xf32, #tpu.memory_space<vmem>>, vector<4x1xf32>
    %c0_3 = arith.constant 0 : index
    %c0_4 = arith.constant 0 : index
    %2 = vector.load %arg3[%c0_3, %c0_4] : memref<4x1xf32, #tpu.memory_space<vmem>>, vector<4x1xf32>
    %c0_5 = arith.constant 0 : index
    %c0_6 = arith.constant 0 : index
    %3 = vector.load %arg4[%c0_5, %c0_6] : memref<4x1xf32, #tpu.memory_space<vmem>>, vector<4x1xf32>
    %c0_7 = arith.constant 0 : index
    %c0_8 = arith.constant 0 : index
    %4 = vector.load %arg6[%c0_7, %c0_8] : memref<2x1xf32, #tpu.memory_space<vmem>>, vector<2x1xf32>
    %c0_9 = arith.constant 0 : index
    %c0_10 = arith.constant 0 : index
    %c0_11 = arith.constant 0 : index
    %5 = vector.load %arg0[%c0_9, %c0_10, %c0_11] : memref<2x72x256xf32, #tpu.memory_space<vmem>>, vector<1x72x256xf32>
    %6 = vector.shape_cast %5 : vector<1x72x256xf32> to vector<72x256xf32>
    %cst = arith.constant dense<0.000000e+00> : vector<4x256xf32>
    %7 = tpu.matmul %0, %6, %cst {dimension_numbers = #tpu.dot_dimension_numbers<[1], [0], [0], [1], [0, 0, 1, 1], [], []>} : vector<4x72xf32>, vector<72x256xf32>, vector<4x256xf32> -> vector<4x256xf32>
    %8 = vector.broadcast %1 : vector<4x1xf32> to vector<4x256xf32>
    %9 = arith.addf %7, %8 : vector<4x256xf32>
    %10 = vector.shape_cast %9 : vector<4x256xf32> to vector<1x4x256xf32>
    %cst_12 = arith.constant dense<0.000000e+00> : vector<1xf32>
    %11 = vector.multi_reduction <add>, %10, %cst_12 [1, 2] : vector<1x4x256xf32> to vector<1xf32>
    %12 = vector.shape_cast %11 : vector<1xf32> to vector<1x1x1xf32>
    %13 = vector.extract %12[0, 0, 0] : f32 from vector<1x1x1xf32>
    %14 = arith.mulf %9, %9 : vector<4x256xf32>
    %15 = vector.shape_cast %14 : vector<4x256xf32> to vector<1x4x256xf32>
    %cst_13 = arith.constant dense<0.000000e+00> : vector<1xf32>
    %16 = vector.multi_reduction <add>, %15, %cst_13 [1, 2] : vector<1x4x256xf32> to vector<1xf32>
    %17 = vector.shape_cast %16 : vector<1xf32> to vector<1x1x1xf32>
    %18 = vector.extract %17[0, 0, 0] : f32 from vector<1x1x1xf32>
    %cst_14 = arith.constant 1.024000e+03 : f32
    %19 = arith.divf %13, %cst_14 : f32
    %cst_15 = arith.constant 1.024000e+03 : f32
    %20 = arith.divf %18, %cst_15 : f32
    %21 = arith.mulf %19, %19 : f32
    %22 = arith.subf %20, %21 : f32
    %cst_16 = arith.constant 0.000000e+00 : f32
    %23 = arith.maximumf %22, %cst_16 : f32
    %cst_17 = arith.constant 9.99999974E-6 : f32
    %24 = arith.addf %23, %cst_17 : f32
    %25 = math.rsqrt %24 : f32
    %26 = vector.broadcast %19 : f32 to vector<4x256xf32>
    %27 = arith.subf %9, %26 : vector<4x256xf32>
    %28 = vector.broadcast %25 : f32 to vector<4x256xf32>
    %29 = arith.mulf %27, %28 : vector<4x256xf32>
    %30 = vector.broadcast %2 : vector<4x1xf32> to vector<4x256xf32>
    %31 = arith.mulf %29, %30 : vector<4x256xf32>
    %32 = vector.broadcast %3 : vector<4x1xf32> to vector<4x256xf32>
    %33 = arith.addf %31, %32 : vector<4x256xf32>
    %cst_18 = arith.constant 5.000000e-01 : f32
    %34 = vector.broadcast %cst_18 : f32 to vector<4x256xf32>
    %35 = arith.mulf %34, %33 : vector<4x256xf32>
    %cst_19 = arith.constant 0.707106769 : f32
    %36 = vector.broadcast %cst_19 : f32 to vector<4x256xf32>
    %37 = arith.mulf %33, %36 : vector<4x256xf32>
    %38 = math.erf %37 : vector<4x256xf32>
    %cst_20 = arith.constant 1.000000e+00 : f32
    %39 = vector.broadcast %cst_20 : f32 to vector<4x256xf32>
    %40 = arith.addf %39, %38 : vector<4x256xf32>
    %41 = arith.mulf %35, %40 : vector<4x256xf32>
    %cst_21 = arith.constant 0.000000e+00 : f32
    %42 = vector.broadcast %cst_21 : f32 to vector<2x256xf32>
    %c17_i32 = arith.constant 17 : i32
    %43 = tpu.dynamic_rotate %41 by %c17_i32 dim 1 : vector<4x256xf32>, i32 -> vector<4x256xf32>
    %c0_22 = arith.constant 0 : index
    %c0_23 = arith.constant 0 : index
    %c0_24 = arith.constant 0 : index
    %44 = vector.load %arg7[%c0_22, %c0_23, %c0_24] : memref<9x1x256xf32, #tpu.memory_space<vmem>>, vector<1x1x256xf32>
    %45 = vector.shape_cast %44 : vector<1x1x256xf32> to vector<1x256xf32>
    %46 = vector.broadcast %45 : vector<1x256xf32> to vector<4x256xf32>
    %47 = arith.mulf %43, %46 : vector<4x256xf32>
    %c0_25 = arith.constant 0 : index
    %c0_26 = arith.constant 0 : index
    %c0_27 = arith.constant 0 : index
    %48 = vector.load %arg5[%c0_25, %c0_26, %c0_27] : memref<9x2x4xf32, #tpu.memory_space<vmem>>, vector<1x2x4xf32>
    %49 = vector.shape_cast %48 : vector<1x2x4xf32> to vector<2x4xf32>
    %cst_28 = arith.constant dense<0.000000e+00> : vector<2x256xf32>
    %50 = tpu.matmul %49, %47, %cst_28 {dimension_numbers = #tpu.dot_dimension_numbers<[1], [0], [0], [1], [0, 0, 1, 1], [], []>} : vector<2x4xf32>, vector<4x256xf32>, vector<2x256xf32> -> vector<2x256xf32>
    %51 = arith.addf %42, %50 : vector<2x256xf32>
    %c16_i32 = arith.constant 16 : i32
    %52 = tpu.dynamic_rotate %41 by %c16_i32 dim 1 : vector<4x256xf32>, i32 -> vector<4x256xf32>
    %c1 = arith.constant 1 : index
    %c0_29 = arith.constant 0 : index
    %c0_30 = arith.constant 0 : index
    %53 = vector.load %arg7[%c1, %c0_29, %c0_30] : memref<9x1x256xf32, #tpu.memory_space<vmem>>, vector<1x1x256xf32>
    %54 = vector.shape_cast %53 : vector<1x1x256xf32> to vector<1x256xf32>
    %55 = vector.broadcast %54 : vector<1x256xf32> to vector<4x256xf32>
    %56 = arith.mulf %52, %55 : vector<4x256xf32>
    %c1_31 = arith.constant 1 : index
    %c0_32 = arith.constant 0 : index
    %c0_33 = arith.constant 0 : index
    %57 = vector.load %arg5[%c1_31, %c0_32, %c0_33] : memref<9x2x4xf32, #tpu.memory_space<vmem>>, vector<1x2x4xf32>
    %58 = vector.shape_cast %57 : vector<1x2x4xf32> to vector<2x4xf32>
    %cst_34 = arith.constant dense<0.000000e+00> : vector<2x256xf32>
    %59 = tpu.matmul %58, %56, %cst_34 {dimension_numbers = #tpu.dot_dimension_numbers<[1], [0], [0], [1], [0, 0, 1, 1], [], []>} : vector<2x4xf32>, vector<4x256xf32>, vector<2x256xf32> -> vector<2x256xf32>
    %60 = arith.addf %51, %59 : vector<2x256xf32>
    %c15_i32 = arith.constant 15 : i32
    %61 = tpu.dynamic_rotate %41 by %c15_i32 dim 1 : vector<4x256xf32>, i32 -> vector<4x256xf32>
    %c2 = arith.constant 2 : index
    %c0_35 = arith.constant 0 : index
    %c0_36 = arith.constant 0 : index
    %62 = vector.load %arg7[%c2, %c0_35, %c0_36] : memref<9x1x256xf32, #tpu.memory_space<vmem>>, vector<1x1x256xf32>
    %63 = vector.shape_cast %62 : vector<1x1x256xf32> to vector<1x256xf32>
    %64 = vector.broadcast %63 : vector<1x256xf32> to vector<4x256xf32>
    %65 = arith.mulf %61, %64 : vector<4x256xf32>
    %c2_37 = arith.constant 2 : index
    %c0_38 = arith.constant 0 : index
    %c0_39 = arith.constant 0 : index
    %66 = vector.load %arg5[%c2_37, %c0_38, %c0_39] : memref<9x2x4xf32, #tpu.memory_space<vmem>>, vector<1x2x4xf32>
    %67 = vector.shape_cast %66 : vector<1x2x4xf32> to vector<2x4xf32>
    %cst_40 = arith.constant dense<0.000000e+00> : vector<2x256xf32>
    %68 = tpu.matmul %67, %65, %cst_40 {dimension_numbers = #tpu.dot_dimension_numbers<[1], [0], [0], [1], [0, 0, 1, 1], [], []>} : vector<2x4xf32>, vector<4x256xf32>, vector<2x256xf32> -> vector<2x256xf32>
    %69 = arith.addf %60, %68 : vector<2x256xf32>
    %c1_i32 = arith.constant 1 : i32
    %70 = tpu.dynamic_rotate %41 by %c1_i32 dim 1 : vector<4x256xf32>, i32 -> vector<4x256xf32>
    %c3 = arith.constant 3 : index
    %c0_41 = arith.constant 0 : index
    %c0_42 = arith.constant 0 : index
    %71 = vector.load %arg7[%c3, %c0_41, %c0_42] : memref<9x1x256xf32, #tpu.memory_space<vmem>>, vector<1x1x256xf32>
    %72 = vector.shape_cast %71 : vector<1x1x256xf32> to vector<1x256xf32>
    %73 = vector.broadcast %72 : vector<1x256xf32> to vector<4x256xf32>
    %74 = arith.mulf %70, %73 : vector<4x256xf32>
    %c3_43 = arith.constant 3 : index
    %c0_44 = arith.constant 0 : index
    %c0_45 = arith.constant 0 : index
    %75 = vector.load %arg5[%c3_43, %c0_44, %c0_45] : memref<9x2x4xf32, #tpu.memory_space<vmem>>, vector<1x2x4xf32>
    %76 = vector.shape_cast %75 : vector<1x2x4xf32> to vector<2x4xf32>
    %cst_46 = arith.constant dense<0.000000e+00> : vector<2x256xf32>
    %77 = tpu.matmul %76, %74, %cst_46 {dimension_numbers = #tpu.dot_dimension_numbers<[1], [0], [0], [1], [0, 0, 1, 1], [], []>} : vector<2x4xf32>, vector<4x256xf32>, vector<2x256xf32> -> vector<2x256xf32>
    %78 = arith.addf %69, %77 : vector<2x256xf32>
    %c4 = arith.constant 4 : index
    %c0_47 = arith.constant 0 : index
    %c0_48 = arith.constant 0 : index
    %79 = vector.load %arg5[%c4, %c0_47, %c0_48] : memref<9x2x4xf32, #tpu.memory_space<vmem>>, vector<1x2x4xf32>
    %80 = vector.shape_cast %79 : vector<1x2x4xf32> to vector<2x4xf32>
    %cst_49 = arith.constant dense<0.000000e+00> : vector<2x256xf32>
    %81 = tpu.matmul %80, %41, %cst_49 {dimension_numbers = #tpu.dot_dimension_numbers<[1], [0], [0], [1], [0, 0, 1, 1], [], []>} : vector<2x4xf32>, vector<4x256xf32>, vector<2x256xf32> -> vector<2x256xf32>
    %82 = arith.addf %78, %81 : vector<2x256xf32>
    %c255_i32 = arith.constant 255 : i32
    %83 = tpu.dynamic_rotate %41 by %c255_i32 dim 1 : vector<4x256xf32>, i32 -> vector<4x256xf32>
    %c5 = arith.constant 5 : index
    %c0_50 = arith.constant 0 : index
    %c0_51 = arith.constant 0 : index
    %84 = vector.load %arg7[%c5, %c0_50, %c0_51] : memref<9x1x256xf32, #tpu.memory_space<vmem>>, vector<1x1x256xf32>
    %85 = vector.shape_cast %84 : vector<1x1x256xf32> to vector<1x256xf32>
    %86 = vector.broadcast %85 : vector<1x256xf32> to vector<4x256xf32>
    %87 = arith.mulf %83, %86 : vector<4x256xf32>
    %c5_52 = arith.constant 5 : index
    %c0_53 = arith.constant 0 : index
    %c0_54 = arith.constant 0 : index
    %88 = vector.load %arg5[%c5_52, %c0_53, %c0_54] : memref<9x2x4xf32, #tpu.memory_space<vmem>>, vector<1x2x4xf32>
    %89 = vector.shape_cast %88 : vector<1x2x4xf32> to vector<2x4xf32>
    %cst_55 = arith.constant dense<0.000000e+00> : vector<2x256xf32>
    %90 = tpu.matmul %89, %87, %cst_55 {dimension_numbers = #tpu.dot_dimension_numbers<[1], [0], [0], [1], [0, 0, 1, 1], [], []>} : vector<2x4xf32>, vector<4x256xf32>, vector<2x256xf32> -> vector<2x256xf32>
    %91 = arith.addf %82, %90 : vector<2x256xf32>
    %c241_i32 = arith.constant 241 : i32
    %92 = tpu.dynamic_rotate %41 by %c241_i32 dim 1 : vector<4x256xf32>, i32 -> vector<4x256xf32>
    %c6 = arith.constant 6 : index
    %c0_56 = arith.constant 0 : index
    %c0_57 = arith.constant 0 : index
    %93 = vector.load %arg7[%c6, %c0_56, %c0_57] : memref<9x1x256xf32, #tpu.memory_space<vmem>>, vector<1x1x256xf32>
    %94 = vector.shape_cast %93 : vector<1x1x256xf32> to vector<1x256xf32>
    %95 = vector.broadcast %94 : vector<1x256xf32> to vector<4x256xf32>
    %96 = arith.mulf %92, %95 : vector<4x256xf32>
    %c6_58 = arith.constant 6 : index
    %c0_59 = arith.constant 0 : index
    %c0_60 = arith.constant 0 : index
    %97 = vector.load %arg5[%c6_58, %c0_59, %c0_60] : memref<9x2x4xf32, #tpu.memory_space<vmem>>, vector<1x2x4xf32>
    %98 = vector.shape_cast %97 : vector<1x2x4xf32> to vector<2x4xf32>
    %cst_61 = arith.constant dense<0.000000e+00> : vector<2x256xf32>
    %99 = tpu.matmul %98, %96, %cst_61 {dimension_numbers = #tpu.dot_dimension_numbers<[1], [0], [0], [1], [0, 0, 1, 1], [], []>} : vector<2x4xf32>, vector<4x256xf32>, vector<2x256xf32> -> vector<2x256xf32>
    %100 = arith.addf %91, %99 : vector<2x256xf32>
    %c240_i32 = arith.constant 240 : i32
    %101 = tpu.dynamic_rotate %41 by %c240_i32 dim 1 : vector<4x256xf32>, i32 -> vector<4x256xf32>
    %c7 = arith.constant 7 : index
    %c0_62 = arith.constant 0 : index
    %c0_63 = arith.constant 0 : index
    %102 = vector.load %arg7[%c7, %c0_62, %c0_63] : memref<9x1x256xf32, #tpu.memory_space<vmem>>, vector<1x1x256xf32>
    %103 = vector.shape_cast %102 : vector<1x1x256xf32> to vector<1x256xf32>
    %104 = vector.broadcast %103 : vector<1x256xf32> to vector<4x256xf32>
    %105 = arith.mulf %101, %104 : vector<4x256xf32>
    %c7_64 = arith.constant 7 : index
    %c0_65 = arith.constant 0 : index
    %c0_66 = arith.constant 0 : index
    %106 = vector.load %arg5[%c7_64, %c0_65, %c0_66] : memref<9x2x4xf32, #tpu.memory_space<vmem>>, vector<1x2x4xf32>
    %107 = vector.shape_cast %106 : vector<1x2x4xf32> to vector<2x4xf32>
    %cst_67 = arith.constant dense<0.000000e+00> : vector<2x256xf32>
    %108 = tpu.matmul %107, %105, %cst_67 {dimension_numbers = #tpu.dot_dimension_numbers<[1], [0], [0], [1], [0, 0, 1, 1], [], []>} : vector<2x4xf32>, vector<4x256xf32>, vector<2x256xf32> -> vector<2x256xf32>
    %109 = arith.addf %100, %108 : vector<2x256xf32>
    %c239_i32 = arith.constant 239 : i32
    %110 = tpu.dynamic_rotate %41 by %c239_i32 dim 1 : vector<4x256xf32>, i32 -> vector<4x256xf32>
    %c8 = arith.constant 8 : index
    %c0_68 = arith.constant 0 : index
    %c0_69 = arith.constant 0 : index
    %111 = vector.load %arg7[%c8, %c0_68, %c0_69] : memref<9x1x256xf32, #tpu.memory_space<vmem>>, vector<1x1x256xf32>
    %112 = vector.shape_cast %111 : vector<1x1x256xf32> to vector<1x256xf32>
    %113 = vector.broadcast %112 : vector<1x256xf32> to vector<4x256xf32>
    %114 = arith.mulf %110, %113 : vector<4x256xf32>
    %c8_70 = arith.constant 8 : index
    %c0_71 = arith.constant 0 : index
    %c0_72 = arith.constant 0 : index
    %115 = vector.load %arg5[%c8_70, %c0_71, %c0_72] : memref<9x2x4xf32, #tpu.memory_space<vmem>>, vector<1x2x4xf32>
    %116 = vector.shape_cast %115 : vector<1x2x4xf32> to vector<2x4xf32>
    %cst_73 = arith.constant dense<0.000000e+00> : vector<2x256xf32>
    %117 = tpu.matmul %116, %114, %cst_73 {dimension_numbers = #tpu.dot_dimension_numbers<[1], [0], [0], [1], [0, 0, 1, 1], [], []>} : vector<2x4xf32>, vector<4x256xf32>, vector<2x256xf32> -> vector<2x256xf32>
    %118 = arith.addf %109, %117 : vector<2x256xf32>
    %119 = vector.broadcast %4 : vector<2x1xf32> to vector<2x256xf32>
    %120 = arith.addf %118, %119 : vector<2x256xf32>
    %c0_74 = arith.constant 0 : index
    %c0_75 = arith.constant 0 : index
    %c0_76 = arith.constant 0 : index
    %121 = vector.load %arg8[%c0_74, %c0_75, %c0_76] : memref<2x2x256xf32, #tpu.memory_space<vmem>>, vector<1x2x256xf32>
    %122 = vector.shape_cast %121 : vector<1x2x256xf32> to vector<2x256xf32>
    %123 = vector.shape_cast %120 : vector<2x256xf32> to vector<1x2x256xf32>
    tpu.vector_store %arg8[%c0_74, %c0_75, %c0_76], %123 {strides = array<i32>} : memref<2x2x256xf32, #tpu.memory_space<vmem>>, vector<1x2x256xf32>,
    %c1_77 = arith.constant 1 : index
    %c0_78 = arith.constant 0 : index
    %c0_79 = arith.constant 0 : index
    %124 = vector.load %arg0[%c1_77, %c0_78, %c0_79] : memref<2x72x256xf32, #tpu.memory_space<vmem>>, vector<1x72x256xf32>
    %125 = vector.shape_cast %124 : vector<1x72x256xf32> to vector<72x256xf32>
    %cst_80 = arith.constant dense<0.000000e+00> : vector<4x256xf32>
    %126 = tpu.matmul %0, %125, %cst_80 {dimension_numbers = #tpu.dot_dimension_numbers<[1], [0], [0], [1], [0, 0, 1, 1], [], []>} : vector<4x72xf32>, vector<72x256xf32>, vector<4x256xf32> -> vector<4x256xf32>
    %127 = vector.broadcast %1 : vector<4x1xf32> to vector<4x256xf32>
    %128 = arith.addf %126, %127 : vector<4x256xf32>
    %129 = vector.shape_cast %128 : vector<4x256xf32> to vector<1x4x256xf32>
    %cst_81 = arith.constant dense<0.000000e+00> : vector<1xf32>
    %130 = vector.multi_reduction <add>, %129, %cst_81 [1, 2] : vector<1x4x256xf32> to vector<1xf32>
    %131 = vector.shape_cast %130 : vector<1xf32> to vector<1x1x1xf32>
    %132 = vector.extract %131[0, 0, 0] : f32 from vector<1x1x1xf32>
    %133 = arith.mulf %128, %128 : vector<4x256xf32>
    %134 = vector.shape_cast %133 : vector<4x256xf32> to vector<1x4x256xf32>
    %cst_82 = arith.constant dense<0.000000e+00> : vector<1xf32>
    %135 = vector.multi_reduction <add>, %134, %cst_82 [1, 2] : vector<1x4x256xf32> to vector<1xf32>
    %136 = vector.shape_cast %135 : vector<1xf32> to vector<1x1x1xf32>
    %137 = vector.extract %136[0, 0, 0] : f32 from vector<1x1x1xf32>
    %cst_83 = arith.constant 1.024000e+03 : f32
    %138 = arith.divf %132, %cst_83 : f32
    %cst_84 = arith.constant 1.024000e+03 : f32
    %139 = arith.divf %137, %cst_84 : f32
    %140 = arith.mulf %138, %138 : f32
    %141 = arith.subf %139, %140 : f32
    %cst_85 = arith.constant 0.000000e+00 : f32
    %142 = arith.maximumf %141, %cst_85 : f32
    %cst_86 = arith.constant 9.99999974E-6 : f32
    %143 = arith.addf %142, %cst_86 : f32
    %144 = math.rsqrt %143 : f32
    %145 = vector.broadcast %138 : f32 to vector<4x256xf32>
    %146 = arith.subf %128, %145 : vector<4x256xf32>
    %147 = vector.broadcast %144 : f32 to vector<4x256xf32>
    %148 = arith.mulf %146, %147 : vector<4x256xf32>
    %149 = vector.broadcast %2 : vector<4x1xf32> to vector<4x256xf32>
    %150 = arith.mulf %148, %149 : vector<4x256xf32>
    %151 = vector.broadcast %3 : vector<4x1xf32> to vector<4x256xf32>
    %152 = arith.addf %150, %151 : vector<4x256xf32>
    %cst_87 = arith.constant 5.000000e-01 : f32
    %153 = vector.broadcast %cst_87 : f32 to vector<4x256xf32>
    %154 = arith.mulf %153, %152 : vector<4x256xf32>
    %cst_88 = arith.constant 0.707106769 : f32
    %155 = vector.broadcast %cst_88 : f32 to vector<4x256xf32>
    %156 = arith.mulf %152, %155 : vector<4x256xf32>
    %157 = math.erf %156 : vector<4x256xf32>
    %cst_89 = arith.constant 1.000000e+00 : f32
    %158 = vector.broadcast %cst_89 : f32 to vector<4x256xf32>
    %159 = arith.addf %158, %157 : vector<4x256xf32>
    %160 = arith.mulf %154, %159 : vector<4x256xf32>
    %cst_90 = arith.constant 0.000000e+00 : f32
    %161 = vector.broadcast %cst_90 : f32 to vector<2x256xf32>
    %c17_i32_91 = arith.constant 17 : i32
    %162 = tpu.dynamic_rotate %160 by %c17_i32_91 dim 1 : vector<4x256xf32>, i32 -> vector<4x256xf32>
    %c0_92 = arith.constant 0 : index
    %c0_93 = arith.constant 0 : index
    %c0_94 = arith.constant 0 : index
    %163 = vector.load %arg7[%c0_92, %c0_93, %c0_94] : memref<9x1x256xf32, #tpu.memory_space<vmem>>, vector<1x1x256xf32>
    %164 = vector.shape_cast %163 : vector<1x1x256xf32> to vector<1x256xf32>
    %165 = vector.broadcast %164 : vector<1x256xf32> to vector<4x256xf32>
    %166 = arith.mulf %162, %165 : vector<4x256xf32>
    %c0_95 = arith.constant 0 : index
    %c0_96 = arith.constant 0 : index
    %c0_97 = arith.constant 0 : index
    %167 = vector.load %arg5[%c0_95, %c0_96, %c0_97] : memref<9x2x4xf32, #tpu.memory_space<vmem>>, vector<1x2x4xf32>
    %168 = vector.shape_cast %167 : vector<1x2x4xf32> to vector<2x4xf32>
    %cst_98 = arith.constant dense<0.000000e+00> : vector<2x256xf32>
    %169 = tpu.matmul %168, %166, %cst_98 {dimension_numbers = #tpu.dot_dimension_numbers<[1], [0], [0], [1], [0, 0, 1, 1], [], []>} : vector<2x4xf32>, vector<4x256xf32>, vector<2x256xf32> -> vector<2x256xf32>
    %170 = arith.addf %161, %169 : vector<2x256xf32>
    %c16_i32_99 = arith.constant 16 : i32
    %171 = tpu.dynamic_rotate %160 by %c16_i32_99 dim 1 : vector<4x256xf32>, i32 -> vector<4x256xf32>
    %c1_100 = arith.constant 1 : index
    %c0_101 = arith.constant 0 : index
    %c0_102 = arith.constant 0 : index
    %172 = vector.load %arg7[%c1_100, %c0_101, %c0_102] : memref<9x1x256xf32, #tpu.memory_space<vmem>>, vector<1x1x256xf32>
    %173 = vector.shape_cast %172 : vector<1x1x256xf32> to vector<1x256xf32>
    %174 = vector.broadcast %173 : vector<1x256xf32> to vector<4x256xf32>
    %175 = arith.mulf %171, %174 : vector<4x256xf32>
    %c1_103 = arith.constant 1 : index
    %c0_104 = arith.constant 0 : index
    %c0_105 = arith.constant 0 : index
    %176 = vector.load %arg5[%c1_103, %c0_104, %c0_105] : memref<9x2x4xf32, #tpu.memory_space<vmem>>, vector<1x2x4xf32>
    %177 = vector.shape_cast %176 : vector<1x2x4xf32> to vector<2x4xf32>
    %cst_106 = arith.constant dense<0.000000e+00> : vector<2x256xf32>
    %178 = tpu.matmul %177, %175, %cst_106 {dimension_numbers = #tpu.dot_dimension_numbers<[1], [0], [0], [1], [0, 0, 1, 1], [], []>} : vector<2x4xf32>, vector<4x256xf32>, vector<2x256xf32> -> vector<2x256xf32>
    %179 = arith.addf %170, %178 : vector<2x256xf32>
    %c15_i32_107 = arith.constant 15 : i32
    %180 = tpu.dynamic_rotate %160 by %c15_i32_107 dim 1 : vector<4x256xf32>, i32 -> vector<4x256xf32>
    %c2_108 = arith.constant 2 : index
    %c0_109 = arith.constant 0 : index
    %c0_110 = arith.constant 0 : index
    %181 = vector.load %arg7[%c2_108, %c0_109, %c0_110] : memref<9x1x256xf32, #tpu.memory_space<vmem>>, vector<1x1x256xf32>
    %182 = vector.shape_cast %181 : vector<1x1x256xf32> to vector<1x256xf32>
    %183 = vector.broadcast %182 : vector<1x256xf32> to vector<4x256xf32>
    %184 = arith.mulf %180, %183 : vector<4x256xf32>
    %c2_111 = arith.constant 2 : index
    %c0_112 = arith.constant 0 : index
    %c0_113 = arith.constant 0 : index
    %185 = vector.load %arg5[%c2_111, %c0_112, %c0_113] : memref<9x2x4xf32, #tpu.memory_space<vmem>>, vector<1x2x4xf32>
    %186 = vector.shape_cast %185 : vector<1x2x4xf32> to vector<2x4xf32>
    %cst_114 = arith.constant dense<0.000000e+00> : vector<2x256xf32>
    %187 = tpu.matmul %186, %184, %cst_114 {dimension_numbers = #tpu.dot_dimension_numbers<[1], [0], [0], [1], [0, 0, 1, 1], [], []>} : vector<2x4xf32>, vector<4x256xf32>, vector<2x256xf32> -> vector<2x256xf32>
    %188 = arith.addf %179, %187 : vector<2x256xf32>
    %c1_i32_115 = arith.constant 1 : i32
    %189 = tpu.dynamic_rotate %160 by %c1_i32_115 dim 1 : vector<4x256xf32>, i32 -> vector<4x256xf32>
    %c3_116 = arith.constant 3 : index
    %c0_117 = arith.constant 0 : index
    %c0_118 = arith.constant 0 : index
    %190 = vector.load %arg7[%c3_116, %c0_117, %c0_118] : memref<9x1x256xf32, #tpu.memory_space<vmem>>, vector<1x1x256xf32>
    %191 = vector.shape_cast %190 : vector<1x1x256xf32> to vector<1x256xf32>
    %192 = vector.broadcast %191 : vector<1x256xf32> to vector<4x256xf32>
    %193 = arith.mulf %189, %192 : vector<4x256xf32>
    %c3_119 = arith.constant 3 : index
    %c0_120 = arith.constant 0 : index
    %c0_121 = arith.constant 0 : index
    %194 = vector.load %arg5[%c3_119, %c0_120, %c0_121] : memref<9x2x4xf32, #tpu.memory_space<vmem>>, vector<1x2x4xf32>
    %195 = vector.shape_cast %194 : vector<1x2x4xf32> to vector<2x4xf32>
    %cst_122 = arith.constant dense<0.000000e+00> : vector<2x256xf32>
    %196 = tpu.matmul %195, %193, %cst_122 {dimension_numbers = #tpu.dot_dimension_numbers<[1], [0], [0], [1], [0, 0, 1, 1], [], []>} : vector<2x4xf32>, vector<4x256xf32>, vector<2x256xf32> -> vector<2x256xf32>
    %197 = arith.addf %188, %196 : vector<2x256xf32>
    %c4_123 = arith.constant 4 : index
    %c0_124 = arith.constant 0 : index
    %c0_125 = arith.constant 0 : index
    %198 = vector.load %arg5[%c4_123, %c0_124, %c0_125] : memref<9x2x4xf32, #tpu.memory_space<vmem>>, vector<1x2x4xf32>
    %199 = vector.shape_cast %198 : vector<1x2x4xf32> to vector<2x4xf32>
    %cst_126 = arith.constant dense<0.000000e+00> : vector<2x256xf32>
    %200 = tpu.matmul %199, %160, %cst_126 {dimension_numbers = #tpu.dot_dimension_numbers<[1], [0], [0], [1], [0, 0, 1, 1], [], []>} : vector<2x4xf32>, vector<4x256xf32>, vector<2x256xf32> -> vector<2x256xf32>
    %201 = arith.addf %197, %200 : vector<2x256xf32>
    %c255_i32_127 = arith.constant 255 : i32
    %202 = tpu.dynamic_rotate %160 by %c255_i32_127 dim 1 : vector<4x256xf32>, i32 -> vector<4x256xf32>
    %c5_128 = arith.constant 5 : index
    %c0_129 = arith.constant 0 : index
    %c0_130 = arith.constant 0 : index
    %203 = vector.load %arg7[%c5_128, %c0_129, %c0_130] : memref<9x1x256xf32, #tpu.memory_space<vmem>>, vector<1x1x256xf32>
    %204 = vector.shape_cast %203 : vector<1x1x256xf32> to vector<1x256xf32>
    %205 = vector.broadcast %204 : vector<1x256xf32> to vector<4x256xf32>
    %206 = arith.mulf %202, %205 : vector<4x256xf32>
    %c5_131 = arith.constant 5 : index
    %c0_132 = arith.constant 0 : index
    %c0_133 = arith.constant 0 : index
    %207 = vector.load %arg5[%c5_131, %c0_132, %c0_133] : memref<9x2x4xf32, #tpu.memory_space<vmem>>, vector<1x2x4xf32>
    %208 = vector.shape_cast %207 : vector<1x2x4xf32> to vector<2x4xf32>
    %cst_134 = arith.constant dense<0.000000e+00> : vector<2x256xf32>
    %209 = tpu.matmul %208, %206, %cst_134 {dimension_numbers = #tpu.dot_dimension_numbers<[1], [0], [0], [1], [0, 0, 1, 1], [], []>} : vector<2x4xf32>, vector<4x256xf32>, vector<2x256xf32> -> vector<2x256xf32>
    %210 = arith.addf %201, %209 : vector<2x256xf32>
    %c241_i32_135 = arith.constant 241 : i32
    %211 = tpu.dynamic_rotate %160 by %c241_i32_135 dim 1 : vector<4x256xf32>, i32 -> vector<4x256xf32>
    %c6_136 = arith.constant 6 : index
    %c0_137 = arith.constant 0 : index
    %c0_138 = arith.constant 0 : index
    %212 = vector.load %arg7[%c6_136, %c0_137, %c0_138] : memref<9x1x256xf32, #tpu.memory_space<vmem>>, vector<1x1x256xf32>
    %213 = vector.shape_cast %212 : vector<1x1x256xf32> to vector<1x256xf32>
    %214 = vector.broadcast %213 : vector<1x256xf32> to vector<4x256xf32>
    %215 = arith.mulf %211, %214 : vector<4x256xf32>
    %c6_139 = arith.constant 6 : index
    %c0_140 = arith.constant 0 : index
    %c0_141 = arith.constant 0 : index
    %216 = vector.load %arg5[%c6_139, %c0_140, %c0_141] : memref<9x2x4xf32, #tpu.memory_space<vmem>>, vector<1x2x4xf32>
    %217 = vector.shape_cast %216 : vector<1x2x4xf32> to vector<2x4xf32>
    %cst_142 = arith.constant dense<0.000000e+00> : vector<2x256xf32>
    %218 = tpu.matmul %217, %215, %cst_142 {dimension_numbers = #tpu.dot_dimension_numbers<[1], [0], [0], [1], [0, 0, 1, 1], [], []>} : vector<2x4xf32>, vector<4x256xf32>, vector<2x256xf32> -> vector<2x256xf32>
    %219 = arith.addf %210, %218 : vector<2x256xf32>
    %c240_i32_143 = arith.constant 240 : i32
    %220 = tpu.dynamic_rotate %160 by %c240_i32_143 dim 1 : vector<4x256xf32>, i32 -> vector<4x256xf32>
    %c7_144 = arith.constant 7 : index
    %c0_145 = arith.constant 0 : index
    %c0_146 = arith.constant 0 : index
    %221 = vector.load %arg7[%c7_144, %c0_145, %c0_146] : memref<9x1x256xf32, #tpu.memory_space<vmem>>, vector<1x1x256xf32>
    %222 = vector.shape_cast %221 : vector<1x1x256xf32> to vector<1x256xf32>
    %223 = vector.broadcast %222 : vector<1x256xf32> to vector<4x256xf32>
    %224 = arith.mulf %220, %223 : vector<4x256xf32>
    %c7_147 = arith.constant 7 : index
    %c0_148 = arith.constant 0 : index
    %c0_149 = arith.constant 0 : index
    %225 = vector.load %arg5[%c7_147, %c0_148, %c0_149] : memref<9x2x4xf32, #tpu.memory_space<vmem>>, vector<1x2x4xf32>
    %226 = vector.shape_cast %225 : vector<1x2x4xf32> to vector<2x4xf32>
    %cst_150 = arith.constant dense<0.000000e+00> : vector<2x256xf32>
    %227 = tpu.matmul %226, %224, %cst_150 {dimension_numbers = #tpu.dot_dimension_numbers<[1], [0], [0], [1], [0, 0, 1, 1], [], []>} : vector<2x4xf32>, vector<4x256xf32>, vector<2x256xf32> -> vector<2x256xf32>
    %228 = arith.addf %219, %227 : vector<2x256xf32>
    %c239_i32_151 = arith.constant 239 : i32
    %229 = tpu.dynamic_rotate %160 by %c239_i32_151 dim 1 : vector<4x256xf32>, i32 -> vector<4x256xf32>
    %c8_152 = arith.constant 8 : index
    %c0_153 = arith.constant 0 : index
    %c0_154 = arith.constant 0 : index
    %230 = vector.load %arg7[%c8_152, %c0_153, %c0_154] : memref<9x1x256xf32, #tpu.memory_space<vmem>>, vector<1x1x256xf32>
    %231 = vector.shape_cast %230 : vector<1x1x256xf32> to vector<1x256xf32>
    %232 = vector.broadcast %231 : vector<1x256xf32> to vector<4x256xf32>
    %233 = arith.mulf %229, %232 : vector<4x256xf32>
    %c8_155 = arith.constant 8 : index
    %c0_156 = arith.constant 0 : index
    %c0_157 = arith.constant 0 : index
    %234 = vector.load %arg5[%c8_155, %c0_156, %c0_157] : memref<9x2x4xf32, #tpu.memory_space<vmem>>, vector<1x2x4xf32>
    %235 = vector.shape_cast %234 : vector<1x2x4xf32> to vector<2x4xf32>
    %cst_158 = arith.constant dense<0.000000e+00> : vector<2x256xf32>
    %236 = tpu.matmul %235, %233, %cst_158 {dimension_numbers = #tpu.dot_dimension_numbers<[1], [0], [0], [1], [0, 0, 1, 1], [], []>} : vector<2x4xf32>, vector<4x256xf32>, vector<2x256xf32> -> vector<2x256xf32>
    %237 = arith.addf %228, %236 : vector<2x256xf32>
    %238 = vector.broadcast %4 : vector<2x1xf32> to vector<2x256xf32>
    %239 = arith.addf %237, %238 : vector<2x256xf32>
    %c1_159 = arith.constant 1 : index
    %c0_160 = arith.constant 0 : index
    %c0_161 = arith.constant 0 : index
    %240 = vector.load %arg8[%c1_159, %c0_160, %c0_161] : memref<2x2x256xf32, #tpu.memory_space<vmem>>, vector<1x2x256xf32>
    %241 = vector.shape_cast %240 : vector<1x2x256xf32> to vector<2x256xf32>
    %242 = vector.shape_cast %239 : vector<2x256xf32> to vector<1x2x256xf32>
    tpu.vector_store %arg8[%c1_159, %c0_160, %c0_161], %242 {strides = array<i32>} : memref<2x2x256xf32, #tpu.memory_space<vmem>>, vector<1x2x256xf32>,
    return
  }
}

</mosaic_0001>

<bundles_post_ra>
// kernel: tpu_custom_call.1
= control target key start
LH: loop header
LB: loop body
LE: loop exit
PB: predicated region body
PF: predicated region fallthrough
CT: control target
= control target key end

     0   :  { %13 = vsyncpa [#allocation3], 0  ;;  %s2926_s0 = inlined_call_operand.hbm [shape: f32[2,72,256], index: 0, kind: input, shape index: {}]   ;;  %s2927_s1 = inlined_call_operand.vmem [shape: f32[4,72], index: 1, kind: input, shape index: {}]   ;;  %s2928_s2 = inlined_call_operand.vmem [shape: f32[4,1], index: 2, kind: input, shape index: {}]   ;;  %s2929_s3 = inlined_call_operand.vmem [shape: f32[4,1], index: 3, kind: input, shape index: {}]   ;;  %s2930_s4 = inlined_call_operand.vmem [shape: f32[4,1], index: 4, kind: input, shape index: {}]   ;;  %s2931_s5 = inlined_call_operand.vmem [shape: f32[9,2,4], index: 5, kind: input, shape index: {}]   ;;  %s2932_s6 = inlined_call_operand.vmem [shape: f32[2,1], index: 6, kind: input, shape index: {}]   ;;  %s2933_s7 = inlined_call_operand.vmem [shape: f32[9,1,256], index: 7, kind: input, shape index: {}]   ;;  %s2934_s8 = inlined_call_operand.hbm [shape: f32[2,2,256], index: 8, kind: output, shape index: {}]  }
   0x1   :  { %14 = vsyncpa [#allocation4], 0  ;;  %s2423_s27 = smov [#allocation2]  }
   0x2   :  { %s20_s28 = sshll.u32 %s2423_s27, 4  ;;  %s21_s28 = int_to_ptr.vmem [resolvable:$true] %s20_s28 }
   0x3   :  { %s2387_s29 = scalar_lea.vmem %s21_s28, 4608  ;;  %p2392_p1 = scmp.lt.s32.totalorder %s21_s28, %s21_s28 }
   0x4   :  { %p2388_p0 = scmp.ne.s32.totalorder %s21_s28, %s2387_s29  ;;  %p2393_p2 = scmp.lt.s32.totalorder %s2387_s29, %s2387_s29 }
   0x6   :  { %p2394_p3 = por %p2393_p2, %p2392_p1 }
   0x8   :  { %p2395_p4 = pnand %p2394_p3, %p2388_p0 }
   0xa   :  { %2398 = shalt.err (!%p2395_p4)
}
   0xb   :  { %s2424_s30 = smov 256   ;;  %s2425_s9 = smov 16  }
   0xc   :  { %26 = dma.hbm_to_vmem [thread:$0]  %s2926_s0, 4608, %s21_s28, [#allocation3], %s2424_s30, %s2424_s30, %s2425_s9  }
   0xd   :  { %2419 = dma.done.wait [#allocation3], 4608  }
   0xe   :  { %2420 = vsyncadd [#allocation3], 4294962688  ;;  %v2426_v0 = vmov 0.0   ;;  %v2427_v1 = vmov 0   ;;  %v66_v2 = vld [vmem:[#allocation2 + $0x88] sm:$0xff]  ;;  %v65_v3 = vld [vmem:[#allocation2 + $0x80] sm:$0xff] }
   0xf   :  { %140 = vmatprep.mubr.f32.mxu0 %v2426_v0  ;;  %2365 = vset.pattern.permute.xlu0 %v2427_v1  ;;  %v64_v4 = vld [vmem:[#allocation2 + $0x78] sm:$0xff]  ;;  %v63_v5 = vld [vmem:[#allocation2 + $0x70] sm:$0xff]  ;;  %v62_v6 = vld [vmem:[#allocation2 + $0x68] sm:$0xff]  ;;  %vm72_vm0 = vcmask 588800   ;;  %vm147_vm1 = vcmask 1043456   ;;  %s2428_s21 = smov 0.0  }
  0x10   :  { %2366 = vset.pattern.permute.xlu1 %v2427_v1  ;;  %339 = vmatprep.mubr.f32.mxu1 %v2426_v0  ;;  %v61_v7 = vld [vmem:[#allocation2 + $0x60] sm:$0xff]  ;;  %v60_v8 = vld [vmem:[#allocation2 + $0x58] sm:$0xff]  ;;  %v59_v9 = vld [vmem:[#allocation2 + $0x50] sm:$0xff]  ;;  %s2429_s25 = smov 127   ;;  %s2430_s26 = smov 112   ;;  %vm265_vm4 = vcmask 31744  }
  0x11   :  { %90 = vmatprep.subr.mxu0 %v66_v2  ;;  %v58_v10 = vld [vmem:[#allocation2 + $0x48] sm:$0xff]  ;;  %v45_v11 = vld [vmem:[%s2928_s2] sm:$0xf]  ;;  %v56_v13 = vld [vmem:[#allocation2 + $0x38] sm:$0xff]  ;;  %s2431_s2 = smov 17   ;;  %s2432_s13 = smov 1  }
  0x12   :  { %91 = vmatpush1.msra.mxu0 %v65_v3  ;;  %v57_v12 = vld [vmem:[#allocation2 + $0x40] sm:$0xff]  ;;  %69 = vperm.xlu0 %2365, %v45_v11   ;;  %v55_v14 = vld [vmem:[#allocation2 + $0x30] sm:$0xff]  ;;  %v54_v15 = vld [vmem:[#allocation2 + $0x28] sm:$0xff]  ;;  %s2434_s14 = smov 113   ;;  %s2435_s15 = smov 111  }
  0x13   :  { %92 = vmatprep.subr.mxu0 %v64_v4  ;;  %v53_v16 = vld [vmem:[#allocation2 + $0x20] sm:$0xff]  ;;  %v52_v17 = vld [vmem:[#allocation2 + $0x18] sm:$0xff]  ;;  %v51_v18 = vld [vmem:[#allocation2 + $0x10] sm:$0xff] }
  0x14   :  { %93 = vmatpush1.msra.mxu0 %v63_v5  ;;  %v50_v19 = vld [vmem:[#allocation2 + $0x8] sm:$0xff]  ;;  %v49_v20 = vld [vmem:[#allocation2] sm:$0xff] }
  0x15   :  { %94 = vmatprep.subr.mxu0 %v62_v6  ;;  %v2496_v21 = vld [vmem:[%s2927_s1] sm:$0xf]  ;;  %s2433_s1 = smov 15  }
  0x16   :  { %95 = vmatpush1.msra.mxu0 %v61_v7  ;;  %v46_v35 = vld [vmem:[%s2929_s3] sm:$0xf] }
  0x17   :  { %96 = vmatprep.subr.mxu0 %v60_v8  ;;  %v47_v36 = vld [vmem:[%s2930_s4] sm:$0xf] }
  0x18   :  { %97 = vmatpush1.msra.mxu0 %v59_v9 }
  0x19   :  { %98 = vmatprep.subr.mxu0 %v58_v10 }
  0x1a   :  { %99 = vmatpush1.msra.mxu0 %v57_v12  ;;  %v221_v12 = vlaneseq }
  0x1b   :  { %100 = vmatprep.subr.mxu0 %v56_v13 }
  0x1c   :  { %101 = vmatpush1.msra.mxu0 %v55_v14  ;;  %v229_v13 = vshrl.u32 %v221_v12, 7  ;;  %v2536_v14 = vand.u32 127, %v221_v12 }
  0x1d   :  { %102 = vmatprep.subr.mxu0 %v54_v15 }
  0x1e   :  { %103 = vmatpush1.msra.mxu0 %v53_v16  ;;  %v2538_v15 = vsub.s32 0, %v229_v13  ;;  %v2540_v16 = vsub.s32 1, %v229_v13  ;;  %vm726_vm2 = vcmp.lt.s32.totalorder %v2536_v14, 127  ;;  %vm938_vm3 = vcmp.lt.s32.totalorder %v2536_v14, 112 }
  0x1f   :  { %104 = vmatprep.subr.mxu0 %v52_v17  ;;  %v2272_v17 = vld [vmem:[%s2933_s7 + $0xa] sm:$0x3]  ;;  %vm245_vm5 = vcmp.lt.s32.totalorder %v2536_v14, 16  ;;  %vm223_vm6 = vcmp.lt.s32.totalorder %v2536_v14, 17  ;;  %vm430_vm7 = vcmp.lt.s32.totalorder %v2536_v14, 15  ;;  %vm536_vm8 = vcmp.lt.s32.totalorder %v2536_v14, 1 }
  0x20   :  { %105 = vmatpush1.msra.mxu0 %v51_v18  ;;  %vm832_vm9 = vcmp.lt.s32.totalorder %v2536_v14, 113  ;;  %vm1044_vm10 = vcmp.lt.s32.totalorder %v2536_v14, 111 }
  0x21   :  { %106 = vmatprep.subr.mxu0 %v50_v19  ;;  %v735_v19 = vrot.slane %v2272_v17, %v2538_v15 }
  0x22   :  { %107 = vmatpush1.msra.mxu0 %v49_v20  ;;  %v739_v20 = vrot.slane %v2272_v17, %v2540_v16  ;;  %v2250_v17 = vld [vmem:[%s2933_s7 + $0x2] sm:$0x3] }
  0x23   :  { %2249 = vmatmul.mubr.msk.f32.vlgmr.msra.gmra.mxu0 %vm72_vm0, %v2496_v21 }
  0x24   :  { %819 = vmatprep.mubr.f32.mxu0 %v2426_v0 }
  0x8d   :  { %v2501_v22 = vpop.permute.xlu0 %69 }
  0xe3   :  { %v142_v23 = vpop.f32.mrf.mxu0 }
  0xe4   :  { %v143_v24 = vadd.f32 %v142_v23, %v2501_v22  ;;  %v2282_v23 = vld [vmem:[%s2933_s7 + $0xe] sm:$0x3] }
  0xe5   :  { %v144_v25 = vpop.f32.mrf.mxu0 }
  0xe6   :  { %v145_v26 = vadd.f32 %v144_v25, %v2501_v22  ;;  %v160_v27 = vmul.f32 %v143_v24, %v143_v24  ;;  %v148_v28 = vsel %vm147_vm1, %v143_v24, 0.0 }
  0xe8   :  { %v149_v29 = vsel %vm147_vm1, %v145_v26, 0.0  ;;  %v161_v30 = vmul.f32 %v145_v26, %v145_v26  ;;  %v162_v32 = vsel %vm147_vm1, %v160_v27, 0.0 }
  0xe9   :  { %v150_v31 = vadd.f32 %v149_v29, %v148_v28  ;;  %v947_v29 = vrot.slane %v2282_v23, %v2538_v15 }
  0xea   :  { %v163_v33 = vsel %vm147_vm1, %v161_v30, 0.0  ;;  %v951_v30 = vrot.slane %v2282_v23, %v2540_v16 }
  0xeb   :  { %151 = vadd.xlane.f32.xlu0 %v150_v31  ;;  %v164_v34 = vadd.f32 %v163_v33, %v162_v32  ;;  %v2273_v31 = vld [vmem:[%s2931_s5 + $0xa] sm:$0x3] }
  0xed   :  { %165 = vadd.xlane.f32.xlu1 %v164_v34 }
  0xfe   :  { %195 = vperm.xlu1 %2366, %v46_v35  }
 0x102   :  { %202 = vperm.xlu1 %2366, %v47_v36  }
 0x174   :  { %v152_v37 = vpop.xlane.xlu0 %151 }
 0x175   :  { %v153_v38 = vrot.slane %v152_v37, 4 }
 0x176   :  { %v166_v39 = vpop.xlane.xlu1 %165 }
 0x177   :  { %v154_v40 = vadd.f32 %v153_v38, %v152_v37  ;;  %v167_v41 = vrot.slane %v166_v39, 4  ;;  %v2283_v38 = vld [vmem:[%s2931_s5 + $0xe] sm:$0x3] }
 0x179   :  { %v155_v42 = vrot.slane %v154_v40, 2  ;;  %v168_v43 = vadd.f32 %v167_v41, %v166_v39  ;;  %v1183_v39 = vld [vmem:[#allocation2 + $0x118] sm:$0xff]  ;;  %v1181_v41 = vld [vmem:[#allocation2 + $0x108] sm:$0xff] }
 0x17a   :  { %v2516_v54 = vpop.permute.xlu1 %195 }
 0x17b   :  { %v169_v44 = vrot.slane %v168_v43, 2  ;;  %v156_v45 = vadd.f32 %v155_v42, %v154_v40  ;;  %v1182_v40 = vld [vmem:[#allocation2 + $0x110] sm:$0xff]  ;;  %v1180_v42 = vld [vmem:[#allocation2 + $0x100] sm:$0xff] }
 0x17d   :  { %v157_v46 = vrot.slane %v156_v45, 1  ;;  %v170_v47 = vadd.f32 %v169_v44, %v168_v43  ;;  %v1179_v43 = vld [vmem:[#allocation2 + $0xf8] sm:$0xff]  ;;  %v1178_v44 = vld [vmem:[#allocation2 + $0xf0] sm:$0xff] }
 0x17e   :  { %v2520_v62 = vpop.permute.xlu1 %202 }
 0x17f   :  { %v158_v48 = vadd.f32 %v157_v46, %v156_v45  ;;  %v171_v49 = vrot.slane %v170_v47, 1  ;;  %v1177_v45 = vld [vmem:[#allocation2 + $0xe8] sm:$0xff]  ;;  %v1176_v46 = vld [vmem:[#allocation2 + $0xe0] sm:$0xff] }
 0x181   :  { %2337 = vpush %v158_v48  ;;  %v172_v50 = vadd.f32 %v171_v49, %v170_v47  ;;  %v1175_v47 = vld [vmem:[#allocation2 + $0xd8] sm:$0xff]  ;;  %v1174_v48 = vld [vmem:[#allocation2 + $0xd0] sm:$0xff]  ;;  %v1173_v49 = vld [vmem:[#allocation2 + $0xc8] sm:$0xff] }
 0x183   :  { %2339 = vpush %v172_v50  ;;  %v1172_v50 = vld [vmem:[#allocation2 + $0xc0] sm:$0xff] }
 0x1b2   :  { %s2338_s3 = spop %2337 }
 0x1b3   :  { %s176_s17 = smul.f32 0.0009765625, %s2338_s3 }
 0x1b4   :  { %s2340_s4 = spop %2339 }
 0x1b5   :  { %s180_s18 = smul.f32 %s176_s17, %s176_s17  ;;  %v187_v53 = vstv %s176_s17 }
 0x1b6   :  { %s179_s19 = smul.f32 0.0009765625, %s2340_s4  ;;  %v188_v55 = vsub.f32 %v143_v24, %v187_v53  ;;  %v189_v56 = vsub.f32 %v145_v26, %v187_v53  ;;  %v1169_v53 = vld [vmem:[#allocation2 + $0xa8] sm:$0xff] }
 0x1b8   :  { %s181_s20 = ssub.f32 %s179_s19, %s180_s18 }
 0x1ba   :  { %s182_s22 = smax.f32 %s2428_s21, %s181_s20 }
 0x1bb   :  { %s183_s23 = sadd.f32 1e-05, %s182_s22 }
 0x1bd   :  { %v184_v51 = vstv %s183_s23 }
 0x1be   :  { %2367 = vrsqrt.f32 %v184_v51  ;;  %v1171_v51 = vld [vmem:[#allocation2 + $0xb8] sm:$0xff] }
 0x1cb   :  { %v2368_v52 = vpop.eup %2367 }
 0x1cc   :  { %2341 = vpush %v2368_v52  ;;  %v1170_v52 = vld [vmem:[#allocation2 + $0xb0] sm:$0xff] }
 0x1fd   :  { %s2342_s24 = spop %2341 }
 0x1fe   :  { %v190_v57 = vstv %s2342_s24 }
 0x1ff   :  { %v191_v58 = vmul.f32 %v190_v57, %v188_v55  ;;  %v192_v59 = vmul.f32 %v190_v57, %v189_v56  ;;  %v1168_v55 = vld [vmem:[#allocation2 + $0xa0] sm:$0xff]  ;;  %v1167_v56 = vld [vmem:[#allocation2 + $0x98] sm:$0xff]  ;;  %v1166_v57 = vld [vmem:[#allocation2 + $0x90] sm:$0xff] }
 0x201   :  { %v198_v60 = vmul.f32 %v2516_v54, %v191_v58  ;;  %v199_v61 = vmul.f32 %v2516_v54, %v192_v59 }
 0x203   :  { %v205_v63 = vadd.f32 %v2520_v62, %v198_v60  ;;  %v206_v1 = vadd.f32 %v2520_v62, %v199_v61 }
 0x205   :  { %v209_v2 = vmul.f32 0.70710677, %v205_v63  ;;  %v210_v3 = vmul.f32 0.70710677, %v206_v1  ;;  %v207_v6 = vmul.f32 0.5, %v205_v63  ;;  %v208_v8 = vmul.f32 0.5, %v206_v1 }
 0x207   :  { %2369 = verf.f32 %v209_v2 }
 0x208   :  { %2371 = verf.f32 %v210_v3 }
 0x214   :  { %v2370_v4 = vpop.eup %2369 }
 0x215   :  { %v2372_v5 = vpop.eup %2371  ;;  %v213_v7 = vadd.f32 1.0, %v2370_v4 }
 0x216   :  { %v214_v9 = vadd.f32 1.0, %v2372_v5 }
 0x217   :  { %v2524_v10 = vmul.f32 %v213_v7, %v207_v6 }
 0x218   :  { %v2526_v11 = vmul.f32 %v214_v9, %v208_v8 }
 0x219   :  { %722 = vrot.lane.b32.xlu1 %v2524_v10, %s2429_s25 }
 0x21a   :  { %936 = vrot.lane.b32.xlu0 %v2526_v11, %s2430_s26 }
 0x21d   :  { %724 = vrot.lane.b32.xlu1 %v2526_v11, %s2429_s25 }
 0x221   :  { %934 = vrot.lane.b32.xlu1 %v2524_v10, %s2430_s26 }
 0x28b   :  { %v723_v18 = vpop.permute.xlu1 %722 }
 0x28c   :  { %v937_v32 = vpop.permute.xlu0 %936 }
 0x28f   :  { %v725_v24 = vpop.permute.xlu1 %724 }
 0x290   :  { %v727_v25 = vsel %vm726_vm2, %v723_v18, %v725_v24  ;;  %v728_v26 = vsel %vm726_vm2, %v725_v24, %v723_v18  ;;  %v254_v24 = vrot.slane %v2250_v17, %v2538_v15 }
 0x291   :  { %v742_v27 = vmul.f32 %v735_v19, %v727_v25  ;;  %v743_v28 = vmul.f32 %v739_v20, %v728_v26  ;;  %v258_v25 = vrot.slane %v2250_v17, %v2540_v16 }
 0x293   :  { %2274 = vmatprep.subr.msk.mxu0 %vm147_vm1, %v743_v28  ;;  %v935_v33 = vpop.permute.xlu1 %934 }
 0x294   :  { %v939_v34 = vsel %vm938_vm3, %v935_v33, %v937_v32  ;;  %v940_v35 = vsel %vm938_vm3, %v937_v32, %v935_v33  ;;  %2275 = vmatpush1.msk.msra.mxu0 %vm147_vm1, %v742_v27  ;;  %v226_v32 = vld [vmem:[%s2933_s7] sm:$0x3] }
 0x295   :  { %v954_v36 = vmul.f32 %v947_v29, %v939_v34  ;;  %v955_v37 = vmul.f32 %v951_v30, %v940_v35  ;;  %2276 = vmatmul.mubr.msk.f32.vlgmr.msra.gmra.mxu0 %vm265_vm4, %v2273_v31 }
 0x296   :  { %1031 = vmatprep.mubr.f32.mxu0 %v2426_v0 }
 0x297   :  { %2284 = vmatprep.subr.msk.mxu0 %vm147_vm1, %v955_v37 }
 0x298   :  { %2285 = vmatpush1.msk.msra.mxu0 %vm147_vm1, %v954_v36 }
 0x299   :  { %2286 = vmatmul.mubr.msk.f32.vlgmr.msra.gmra.mxu0 %vm265_vm4, %v2283_v38  ;;  %1198 = vmatprep.subr.mxu0 %v1183_v39  ;;  %v2251_v39 = vld [vmem:[%s2931_s5 + $0x2] sm:$0x3] }
 0x29a   :  { %1199 = vmatpush1.msra.mxu0 %v1182_v40  ;;  %1248 = vmatprep.mubr.f32.mxu0 %v2426_v0  ;;  %v231_v40 = vrot.slane %v226_v32, %v2538_v15 }
 0x29b   :  { %1200 = vmatprep.subr.mxu0 %v1181_v41  ;;  %v235_v41 = vrot.slane %v226_v32, %v2540_v16 }
 0x29c   :  { %1201 = vmatpush1.msra.mxu0 %v1180_v42 }
 0x29d   :  { %1202 = vmatprep.subr.mxu0 %v1179_v43 }
 0x29e   :  { %1203 = vmatpush1.msra.mxu0 %v1178_v44 }
 0x29f   :  { %1204 = vmatprep.subr.mxu0 %v1177_v45 }
 0x2a0   :  { %1205 = vmatpush1.msra.mxu0 %v1176_v46 }
 0x2a1   :  { %1206 = vmatprep.subr.mxu0 %v1175_v47 }
 0x2a2   :  { %1207 = vmatpush1.msra.mxu0 %v1174_v48 }
 0x2a3   :  { %1208 = vmatprep.subr.mxu0 %v1173_v49 }
 0x2a4   :  { %1209 = vmatpush1.msra.mxu0 %v1172_v50  ;;  %v2258_v50 = vld [vmem:[%s2933_s7 + $0x4] sm:$0x3] }
 0x2a5   :  { %1210 = vmatprep.subr.mxu0 %v1171_v51  ;;  %v240_v51 = vld [vmem:[%s2931_s5] sm:$0x3] }
 0x2a6   :  { %1211 = vmatpush1.msra.mxu0 %v1170_v52 }
 0x2a7   :  { %1212 = vmatprep.subr.mxu0 %v1169_v53  ;;  %v439_v53 = vrot.slane %v2258_v50, %v2538_v15 }
 0x2a8   :  { %1213 = vmatpush1.msra.mxu0 %v1168_v55  ;;  %v443_v55 = vrot.slane %v2258_v50, %v2540_v16 }
 0x2a9   :  { %1214 = vmatprep.subr.mxu0 %v1167_v56  ;;  %v2263_v56 = vld [vmem:[%s2933_s7 + $0x6] sm:$0x3] }
 0x2aa   :  { %1215 = vmatpush1.msra.mxu0 %v1166_v57 }
 0x2ab   :  { %2293 = vmatmul.mubr.msk.f32.vlgmr.msra.gmra.mxu0 %vm72_vm0, %v2496_v21 }
 0x2ac   :  { %1899 = vmatprep.mubr.f32.mxu0 %v2426_v0 }
 0x355   :  { %v2579_v58 = vpop.f32.mrf.mxu0 }
 0x357   :  { %v2581_v59 = vpop.f32.mrf.mxu0 }
 0x359   :  { %v2583_v60 = vpop.f32.mrf.mxu0 }
 0x35b   :  { %v2585_v61 = vpop.f32.mrf.mxu0 }
 0x36b   :  { %v1250_v63 = vpop.f32.mrf.mxu0 }
 0x36c   :  { %v2588_v1 = vadd.f32 %v1250_v63, %v2501_v22 }
 0x36d   :  { %v1252_v2 = vpop.f32.mrf.mxu0 }
 0x36e   :  { %v2591_v3 = vadd.f32 %v1252_v2, %v2501_v22  ;;  %v1267_v21 = vmul.f32 %v2588_v1, %v2588_v1  ;;  %v1255_v4 = vsel %vm147_vm1, %v2588_v1, 0.0 }
 0x370   :  { %v1256_v5 = vsel %vm147_vm1, %v2591_v3, 0.0  ;;  %v1268_v6 = vmul.f32 %v2591_v3, %v2591_v3  ;;  %v1269_v8 = vsel %vm147_vm1, %v1267_v21, 0.0 }
 0x371   :  { %v1257_v7 = vadd.f32 %v1256_v5, %v1255_v4 }
 0x372   :  { %v1270_v9 = vsel %vm147_vm1, %v1268_v6, 0.0  ;;  %v545_v6 = vrot.slane %v2263_v56, %v2538_v15 }
 0x373   :  { %1258 = vadd.xlane.f32.xlu1 %v1257_v7  ;;  %v1271_v22 = vadd.f32 %v1270_v9, %v1269_v8  ;;  %v549_v7 = vrot.slane %v2263_v56, %v2540_v16  ;;  %v2259_v8 = vld [vmem:[%s2931_s5 + $0x4] sm:$0x3]  ;;  %v2277_v9 = vld [vmem:[%s2933_s7 + $0xc] sm:$0x3] }
 0x375   :  { %1272 = vadd.xlane.f32.xlu0 %v1271_v22 }
 0x384   :  { %241 = vrot.lane.b32.xlu1 %v2524_v10, %s2425_s9 }
 0x388   :  { %217 = vrot.lane.b32.xlu1 %v2524_v10, %s2431_s2 }
 0x38b   :  { %243 = vrot.lane.b32.xlu0 %v2526_v11, %s2425_s9 }
 0x38c   :  { %219 = vrot.lane.b32.xlu1 %v2526_v11, %s2431_s2 }
 0x38f   :  { %534 = vrot.lane.b32.xlu0 %v2526_v11, %s2432_s13 }
 0x390   :  { %426 = vrot.lane.b32.xlu1 %v2524_v10, %s2433_s1 }
 0x393   :  { %830 = vrot.lane.b32.xlu0 %v2526_v11, %s2434_s14 }
 0x394   :  { %428 = vrot.lane.b32.xlu1 %v2526_v11, %s2433_s1 }
 0x397   :  { %1042 = vrot.lane.b32.xlu0 %v2526_v11, %s2435_s15 }
 0x398   :  { %532 = vrot.lane.b32.xlu1 %v2524_v10, %s2432_s13 }
 0x39c   :  { %828 = vrot.lane.b32.xlu1 %v2524_v10, %s2434_s14 }
 0x3a0   :  { %1040 = vrot.lane.b32.xlu1 %v2524_v10, %s2435_s15 }
 0x3fc   :  { %v1259_v12 = vpop.xlane.xlu1 %1258 }
 0x3fd   :  { %v1260_v13 = vrot.slane %v1259_v12, 4 }
 0x3fe   :  { %v1273_v18 = vpop.xlane.xlu0 %1272 }
 0x3ff   :  { %v1261_v19 = vadd.f32 %v1260_v13, %v1259_v12  ;;  %v1274_v20 = vrot.slane %v1273_v18, 4 }
 0x400   :  { %v242_v23 = vpop.permute.xlu1 %241 }
 0x401   :  { %v1262_v26 = vrot.slane %v1261_v19, 2  ;;  %v1275_v27 = vadd.f32 %v1274_v20, %v1273_v18  ;;  %v845_v20 = vrot.slane %v2277_v9, %v2540_v16 }
 0x402   :  { %v244_v28 = vpop.permute.xlu0 %243 }
 0x403   :  { %v1276_v29 = vrot.slane %v1275_v27, 2  ;;  %v246_v30 = vsel %vm245_vm5, %v242_v23, %v244_v28  ;;  %v247_v31 = vsel %vm245_vm5, %v244_v28, %v242_v23  ;;  %v1263_v33 = vadd.f32 %v1262_v26, %v1261_v19  ;;  %v2264_v23 = vld [vmem:[%s2931_s5 + $0x6] sm:$0x3] }
 0x404   :  { %v261_v34 = vmul.f32 %v254_v24, %v247_v31  ;;  %v218_v35 = vpop.permute.xlu1 %217  ;;  %v262_v36 = vmul.f32 %v258_v25, %v246_v30  ;;  %v2287_v24 = vld [vmem:[%s2933_s7 + $0x10] sm:$0x3]  ;;  %v841_v26 = vrot.slane %v2277_v9, %v2538_v15  ;;  %v2268_v31 = vld [vmem:[%s2931_s5 + $0x8] sm:$0x3] }
 0x405   :  { %v1264_v37 = vrot.slane %v1263_v33, 1  ;;  %v1277_v38 = vadd.f32 %v1276_v29, %v1275_v27  ;;  %v1057_v30 = vrot.slane %v2287_v24, %v2540_v16 }
 0x406   :  { %2252 = vmatprep.subr.msk.mxu1 %vm147_vm1, %v262_v36  ;;  %v535_v57 = vpop.permute.xlu0 %534 }
 0x407   :  { %2253 = vmatpush1.msk.msra.mxu1 %vm147_vm1, %v261_v34  ;;  %v1265_v42 = vadd.f32 %v1264_v37, %v1263_v33  ;;  %v1278_v43 = vrot.slane %v1277_v38, 1  ;;  %v2278_v37 = vld [vmem:[%s2931_s5 + $0xc] sm:$0x3] }
 0x408   :  { %v220_v44 = vpop.permute.xlu1 %219  ;;  %2254 = vmatmul.mubr.msk.f32.vlgmr.msra.gmra.mxu1 %vm265_vm4, %v2251_v39  ;;  %v2288_v39 = vld [vmem:[%s2931_s5 + $0x10] sm:$0x3] }
 0x409   :  { %v224_v45 = vsel %vm223_vm6, %v218_v35, %v220_v44  ;;  %v225_v46 = vsel %vm223_vm6, %v220_v44, %v218_v35  ;;  %2343 = vpush %v1265_v42  ;;  %v1279_v47 = vadd.f32 %v1278_v43, %v1277_v38  ;;  %419 = vmatprep.mubr.f32.mxu1 %v2426_v0 }
 0x40a   :  { %v238_v48 = vmul.f32 %v231_v40, %v225_v46  ;;  %v239_v49 = vmul.f32 %v235_v41, %v224_v45  ;;  %v831_v17 = vpop.permute.xlu0 %830 }
 0x40b   :  { %2345 = vpush %v1279_v47 }
 0x40c   :  { %2255 = vmatprep.subr.msk.mxu1 %vm147_vm1, %v239_v49  ;;  %v427_v52 = vpop.permute.xlu1 %426 }
 0x40d   :  { %2256 = vmatpush1.msk.msra.mxu1 %vm147_vm1, %v238_v48 }
 0x40e   :  { %2257 = vmatmul.mubr.msk.f32.vlgmr.msra.gmra.mxu1 %vm265_vm4, %v240_v51  ;;  %v1043_v32 = vpop.permute.xlu0 %1042 }
 0x40f   :  { %523 = vmatprep.mubr.f32.mxu1 %v2426_v0 }
 0x410   :  { %v429_v63 = vpop.permute.xlu1 %428 }
 0x411   :  { %v431_v2 = vsel %vm430_vm7, %v427_v52, %v429_v63  ;;  %v432_v21 = vsel %vm430_vm7, %v429_v63, %v427_v52 }
 0x412   :  { %v446_v4 = vmul.f32 %v439_v53, %v432_v21  ;;  %v447_v5 = vmul.f32 %v443_v55, %v431_v2 }
 0x414   :  { %2260 = vmatprep.subr.msk.mxu1 %vm147_vm1, %v447_v5  ;;  %v533_v22 = vpop.permute.xlu1 %532 }
 0x415   :  { %v537_v12 = vsel %vm536_vm8, %v533_v22, %v535_v57  ;;  %v538_v13 = vsel %vm536_vm8, %v535_v57, %v533_v22  ;;  %2261 = vmatpush1.msk.msra.mxu1 %vm147_vm1, %v446_v4 }
 0x416   :  { %v552_v18 = vmul.f32 %v545_v6, %v538_v13  ;;  %v553_v19 = vmul.f32 %v549_v7, %v537_v12  ;;  %2262 = vmatmul.mubr.msk.f32.vlgmr.msra.gmra.mxu1 %vm265_vm4, %v2259_v8  ;;  %v2294_v6 = vld [vmem:[%s2933_s7 + $0x2] sm:$0x3]  ;;  %v1320_v12 = vld [vmem:[%s2933_s7] sm:$0x3] }
 0x417   :  { %629 = vmatprep.mubr.f32.mxu1 %v2426_v0  ;;  %v1346_v8 = vrot.slane %v2294_v6, %v2538_v15  ;;  %v1350_v9 = vrot.slane %v2294_v6, %v2540_v16 }
 0x418   :  { %2265 = vmatprep.subr.msk.mxu1 %vm147_vm1, %v553_v19  ;;  %v829_v25 = vpop.permute.xlu1 %828 }
 0x419   :  { %v834_v27 = vsel %vm832_vm9, %v831_v17, %v829_v25  ;;  %2266 = vmatpush1.msk.msra.mxu1 %vm147_vm1, %v552_v18  ;;  %v833_v28 = vsel %vm832_vm9, %v829_v25, %v831_v17  ;;  %v1329_v25 = vrot.slane %v1320_v12, %v2540_v16 }
 0x41a   :  { %v849_v29 = vmul.f32 %v845_v20, %v834_v27  ;;  %2267 = vmatmul.mubr.msk.f32.vlgmr.msra.gmra.mxu1 %vm265_vm4, %v2264_v23  ;;  %2269 = vmatprep.subr.msk.mxu1 %vm147_vm1, %v2526_v11  ;;  %v848_v34 = vmul.f32 %v841_v26, %v833_v28  ;;  %v1053_v11 = vrot.slane %v2287_v24, %v2538_v15  ;;  %v2295_v27 = vld [vmem:[%s2931_s5 + $0x2] sm:$0x3]  ;;  %v2302_v28 = vld [vmem:[%s2933_s7 + $0x4] sm:$0x3] }
 0x41b   :  { %2270 = vmatpush1.msk.msra.mxu1 %vm147_vm1, %v2524_v10  ;;  %713 = vmatprep.mubr.f32.mxu1 %v2426_v0  ;;  %v1325_v24 = vrot.slane %v1320_v12, %v2538_v15 }
 0x41c   :  { %2279 = vmatprep.subr.msk.mxu1 %vm147_vm1, %v849_v29  ;;  %v1041_v33 = vpop.permute.xlu1 %1040 }
 0x41d   :  { %v1046_v35 = vsel %vm1044_vm10, %v1043_v32, %v1041_v33  ;;  %v1045_v36 = vsel %vm1044_vm10, %v1041_v33, %v1043_v32 }
 0x41e   :  { %v1061_v10 = vmul.f32 %v1057_v30, %v1046_v35  ;;  %2271 = vmatmul.mubr.msk.f32.vlgmr.msra.gmra.mxu1 %vm265_vm4, %v2268_v31  ;;  %v1060_v38 = vmul.f32 %v1053_v11, %v1045_v36  ;;  %v1527_v11 = vrot.slane %v2302_v28, %v2538_v15  ;;  %v1531_v35 = vrot.slane %v2302_v28, %v2540_v16 }
 0x41f   :  { %2280 = vmatpush1.msk.msra.mxu1 %vm147_vm1, %v848_v34  ;;  %925 = vmatprep.mubr.f32.mxu1 %v2426_v0 }
 0x420   :  { %2289 = vmatprep.subr.msk.mxu1 %vm147_vm1, %v1061_v10  ;;  %v1334_v10 = vld [vmem:[%s2931_s5] sm:$0x3] }
 0x422   :  { %2281 = vmatmul.mubr.msk.f32.vlgmr.msra.gmra.mxu1 %vm265_vm4, %v2278_v37  ;;  %v2307_v37 = vld [vmem:[%s2933_s7 + $0x6] sm:$0x3] }
 0x423   :  { %2290 = vmatpush1.msk.msra.mxu1 %vm147_vm1, %v1060_v38  ;;  %1137 = vmatprep.mubr.f32.mxu1 %v2426_v0 }
 0x426   :  { %2291 = vmatmul.mubr.msk.f32.vlgmr.msra.gmra.mxu1 %vm265_vm4, %v2288_v39 }
 0x427   :  { %1429 = vmatprep.mubr.f32.mxu1 %v2426_v0 }
 0x43a   :  { %s2344_s23 = spop %2343 }
 0x43b   :  { %s1283_s24 = smul.f32 0.0009765625, %s2344_s23 }
 0x43c   :  { %s2346_s27 = spop %2345 }
 0x43d   :  { %s1287_s28 = smul.f32 %s1283_s24, %s1283_s24  ;;  %v1294_v42 = vstv %s1283_s24 }
 0x43e   :  { %s1286_s29 = smul.f32 0.0009765625, %s2346_s27  ;;  %v1295_v43 = vsub.f32 %v2588_v1, %v1294_v42  ;;  %v1296_v44 = vsub.f32 %v2591_v3, %v1294_v42 }
 0x440   :  { %s1288_s30 = ssub.f32 %s1286_s29, %s1287_s28 }
 0x442   :  { %s1289_s10 = smax.f32 %s2428_s21, %s1288_s30 }
 0x443   :  { %s1290_s11 = sadd.f32 1e-05, %s1289_s10 }
 0x445   :  { %v1291_v40 = vstv %s1290_s11 }
 0x446   :  { %2373 = vrsqrt.f32 %v1291_v40 }
 0x453   :  { %v2374_v41 = vpop.eup %2373 }
 0x454   :  { %2347 = vpush %v2374_v41 }
 0x485   :  { %s2348_s0 = spop %2347 }
 0x486   :  { %v1297_v45 = vstv %s2348_s0 }
 0x487   :  { %v1298_v46 = vmul.f32 %v1297_v45, %v1295_v43  ;;  %v1299_v47 = vmul.f32 %v1297_v45, %v1296_v44  ;;  %v1630_v44 = vrot.slane %v2307_v37, %v2538_v15  ;;  %v1634_v45 = vrot.slane %v2307_v37, %v2540_v16 }
 0x489   :  { %v1300_v48 = vmul.f32 %v1298_v46, %v2516_v54  ;;  %v1301_v49 = vmul.f32 %v1299_v47, %v2516_v54  ;;  %v48_v54 = vld [vmem:[%s2932_s6] sm:$0x3] }
 0x48b   :  { %v1302_v50 = vadd.f32 %v1300_v48, %v2520_v62  ;;  %v1303_v51 = vadd.f32 %v1301_v49, %v2520_v62  ;;  %v2303_v49 = vld [vmem:[%s2931_s5 + $0x4] sm:$0x3] }
 0x48d   :  { %v1306_v52 = vmul.f32 0.70710677, %v1302_v50  ;;  %v1307_v53 = vmul.f32 0.70710677, %v1303_v51  ;;  %v1304_v1 = vmul.f32 0.5, %v1302_v50  ;;  %v1305_v3 = vmul.f32 0.5, %v1303_v51 }
 0x48e   :  { %v2316_v50 = vld [vmem:[%s2933_s7 + $0xa] sm:$0x3] }
 0x48f   :  { %2375 = verf.f32 %v1306_v52 }
 0x490   :  { %2377 = verf.f32 %v1307_v53 }
 0x49c   :  { %v2376_v55 = vpop.eup %2375 }
 0x49d   :  { %v2378_v56 = vpop.eup %2377  ;;  %v1310_v57 = vadd.f32 1.0, %v2376_v55 }
 0x49e   :  { %v1311_v63 = vadd.f32 1.0, %v2378_v56 }
 0x49f   :  { %v2745_v2 = vmul.f32 %v1310_v57, %v1304_v1  ;;  %v1816_v57 = vrot.slane %v2316_v50, %v2538_v15 }
 0x4a0   :  { %v2747_v21 = vmul.f32 %v1311_v63, %v1305_v3  ;;  %v1820_v3 = vrot.slane %v2316_v50, %v2540_v16  ;;  %v2321_v63 = vld [vmem:[%s2933_s7 + $0xc] sm:$0x3] }
 0x4a1   :  { %1335 = vrot.lane.b32.xlu1 %v2745_v2, %s2425_s9 }
 0x4a2   :  { %1337 = vrot.lane.b32.xlu0 %v2747_v21, %s2425_s9 }
 0x4a5   :  { %1314 = vrot.lane.b32.xlu1 %v2745_v2, %s2431_s2 }
 0x4a6   :  { %1316 = vrot.lane.b32.xlu0 %v2747_v21, %s2431_s2 }
 0x4a9   :  { %1516 = vrot.lane.b32.xlu1 %v2745_v2, %s2433_s1 }
 0x4aa   :  { %1518 = vrot.lane.b32.xlu0 %v2747_v21, %s2433_s1 }
 0x4ad   :  { %1619 = vrot.lane.b32.xlu1 %v2745_v2, %s2432_s13 }
 0x4ae   :  { %1621 = vrot.lane.b32.xlu0 %v2747_v21, %s2432_s13 }
 0x4b1   :  { %1805 = vrot.lane.b32.xlu1 %v2745_v2, %s2429_s25 }
 0x4b2   :  { %1807 = vrot.lane.b32.xlu0 %v2747_v21, %s2429_s25 }
 0x4b5   :  { %1908 = vrot.lane.b32.xlu1 %v2745_v2, %s2434_s14 }
 0x4b6   :  { %1910 = vrot.lane.b32.xlu0 %v2747_v21, %s2434_s14 }
 0x4b9   :  { %2011 = vrot.lane.b32.xlu1 %v2745_v2, %s2430_s26 }
 0x4ba   :  { %2013 = vrot.lane.b32.xlu0 %v2747_v21, %s2430_s26 }
 0x4bd   :  { %2114 = vrot.lane.b32.xlu1 %v2745_v2, %s2435_s15 }
 0x4be   :  { %2116 = vrot.lane.b32.xlu0 %v2747_v21, %s2435_s15 }
 0x4c1   :  { %1148 = vperm.xlu1 %2366, %v48_v54  }
 0x4c8   :  { %v341_v62 = vpop.f32.mrf.mxu1 }
 0x4ca   :  { %v343_v4 = vpop.f32.mrf.mxu1 }
 0x4ce   :  { %v421_v5 = vpop.f32.mrf.mxu1 }
 0x4cf   :  { %v422_v46 = vadd.f32 %v421_v5, %v341_v62  ;;  %v2308_v5 = vld [vmem:[%s2931_s5 + $0x6] sm:$0x3] }
 0x4d0   :  { %v423_v7 = vpop.f32.mrf.mxu1 }
 0x4d1   :  { %v424_v47 = vadd.f32 %v423_v7, %v343_v4 }
 0x4d6   :  { %v525_v13 = vpop.f32.mrf.mxu1 }
 0x4d7   :  { %v530_v54 = vadd.f32 %v525_v13, %v422_v46  ;;  %v2327_v46 = vld [vmem:[%s2931_s5 + $0xe] sm:$0x3] }
 0x4d8   :  { %v527_v29 = vpop.f32.mrf.mxu1 }
 0x4d9   :  { %v531_v62 = vadd.f32 %v527_v29, %v424_v47 }
 0x4da   :  { %v631_v38 = vpop.f32.mrf.mxu1 }
 0x4dc   :  { %v633_v51 = vpop.f32.mrf.mxu1 }
 0x4de   :  { %v715_v6 = vpop.f32.mrf.mxu1 }
 0x513   :  { %v1336_v22 = vpop.permute.xlu1 %1335 }
 0x514   :  { %v1338_v17 = vpop.permute.xlu0 %1337 }
 0x515   :  { %v1339_v18 = vsel %vm245_vm5, %v1336_v22, %v1338_v17  ;;  %v1340_v19 = vsel %vm245_vm5, %v1338_v17, %v1336_v22  ;;  %v1919_v22 = vrot.slane %v2321_v63, %v2538_v15  ;;  %v1923_v17 = vrot.slane %v2321_v63, %v2540_v16 }
 0x516   :  { %v1353_v20 = vmul.f32 %v1346_v8, %v1340_v19  ;;  %v1354_v23 = vmul.f32 %v1350_v9, %v1339_v18  ;;  %v2326_v18 = vld [vmem:[%s2933_s7 + $0xe] sm:$0x3]  ;;  %v636_v19 = vadd.f32 %v631_v38, %v530_v54 }
 0x517   :  { %v1315_v26 = vpop.permute.xlu1 %1314  ;;  %v2022_v28 = vrot.slane %v2326_v18, %v2538_v15 }
 0x518   :  { %v1317_v30 = vpop.permute.xlu0 %1316  ;;  %2296 = vmatprep.subr.msk.mxu1 %vm147_vm1, %v1354_v23 }
 0x519   :  { %v1318_v31 = vsel %vm223_vm6, %v1315_v26, %v1317_v30  ;;  %v1319_v32 = vsel %vm223_vm6, %v1317_v30, %v1315_v26  ;;  %2297 = vmatpush1.msk.msra.mxu1 %vm147_vm1, %v1353_v20  ;;  %v637_v20 = vadd.f32 %v633_v51, %v531_v62 }
 0x51a   :  { %v1332_v33 = vmul.f32 %v1325_v24, %v1319_v32  ;;  %v1333_v34 = vmul.f32 %v1329_v25, %v1318_v31  ;;  %2298 = vmatmul.mubr.msk.f32.vlgmr.msra.gmra.mxu1 %vm265_vm4, %v2295_v27  ;;  %v2312_v24 = vld [vmem:[%s2931_s5 + $0x8] sm:$0x3]  ;;  %v717_v25 = vpop.f32.mrf.mxu1  ;;  %v2026_v31 = vrot.slane %v2326_v18, %v2540_v16  ;;  %v720_v32 = vadd.f32 %v715_v6, %v636_v19 }
 0x51b   :  { %v1517_v36 = vpop.permute.xlu1 %1516  ;;  %1509 = vmatprep.mubr.f32.mxu1 %v2426_v0 }
 0x51c   :  { %v1519_v39 = vpop.permute.xlu0 %1518  ;;  %2299 = vmatprep.subr.msk.mxu1 %vm147_vm1, %v1333_v34 }
 0x51d   :  { %v1520_v40 = vsel %vm430_vm7, %v1517_v36, %v1519_v39  ;;  %v1521_v41 = vsel %vm430_vm7, %v1519_v39, %v1517_v36  ;;  %2300 = vmatpush1.msk.msra.mxu1 %vm147_vm1, %v1332_v33  ;;  %v721_v33 = vadd.f32 %v717_v25, %v637_v20  ;;  %v927_v36 = vpop.f32.mrf.mxu1 }
 0x51e   :  { %v1534_v42 = vmul.f32 %v1527_v11, %v1521_v41  ;;  %v1535_v43 = vmul.f32 %v1531_v35, %v1520_v40  ;;  %2301 = vmatmul.mubr.msk.f32.vlgmr.msra.gmra.mxu1 %vm265_vm4, %v1334_v10  ;;  %v2322_v11 = vld [vmem:[%s2931_s5 + $0xc] sm:$0x3]  ;;  %v2331_v35 = vld [vmem:[%s2933_s7 + $0x10] sm:$0x3] }
 0x51f   :  { %v1620_v48 = vpop.permute.xlu1 %1619  ;;  %1610 = vmatprep.mubr.f32.mxu1 %v2426_v0  ;;  %v2125_v41 = vrot.slane %v2331_v35, %v2538_v15  ;;  %v929_v47 = vpop.f32.mrf.mxu1 }
 0x520   :  { %v1622_v52 = vpop.permute.xlu0 %1621  ;;  %2304 = vmatprep.subr.msk.mxu1 %vm147_vm1, %v1535_v43  ;;  %v826_v43 = vadd.f32 %v2579_v58, %v720_v32 }
 0x521   :  { %v1623_v53 = vsel %vm536_vm8, %v1620_v48, %v1622_v52  ;;  %v1624_v55 = vsel %vm536_vm8, %v1622_v52, %v1620_v48  ;;  %2305 = vmatpush1.msk.msra.mxu1 %vm147_vm1, %v1534_v42  ;;  %v2129_v42 = vrot.slane %v2331_v35, %v2540_v16  ;;  %v1139_v51 = vpop.f32.mrf.mxu1 }
 0x522   :  { %v1637_v56 = vmul.f32 %v1630_v44, %v1624_v55  ;;  %v1638_v1 = vmul.f32 %v1634_v45, %v1623_v53  ;;  %2306 = vmatmul.mubr.msk.f32.vlgmr.msra.gmra.mxu1 %vm265_vm4, %v2303_v49  ;;  %v827_v44 = vadd.f32 %v2581_v59, %v721_v33  ;;  %v932_v49 = vadd.f32 %v927_v36, %v826_v43 }
 0x523   :  { %v1806_v4 = vpop.permute.xlu1 %1805  ;;  %1713 = vmatprep.mubr.f32.mxu1 %v2426_v0  ;;  %v1141_v53 = vpop.f32.mrf.mxu1 }
 0x524   :  { %v1808_v7 = vpop.permute.xlu0 %1807  ;;  %2309 = vmatprep.subr.msk.mxu1 %vm147_vm1, %v1638_v1  ;;  %v933_v50 = vadd.f32 %v929_v47, %v827_v44  ;;  %v1038_v14 = vadd.f32 %v2583_v60, %v932_v49 }
 0x525   :  { %v1809_v8 = vsel %vm726_vm2, %v1806_v4, %v1808_v7  ;;  %v1810_v9 = vsel %vm726_vm2, %v1808_v7, %v1806_v4  ;;  %2310 = vmatpush1.msk.msra.mxu1 %vm147_vm1, %v1637_v56 }
 0x526   :  { %v1823_v12 = vmul.f32 %v1816_v57, %v1809_v8  ;;  %v1824_v13 = vmul.f32 %v1820_v3, %v1810_v9  ;;  %2311 = vmatmul.mubr.msk.f32.vlgmr.msra.gmra.mxu1 %vm265_vm4, %v2308_v5  ;;  %2313 = vmatprep.subr.msk.mxu1 %vm147_vm1, %v2747_v21  ;;  %v2317_v21 = vld [vmem:[%s2931_s5 + $0xa] sm:$0x3]  ;;  %v1039_v52 = vadd.f32 %v2585_v61, %v933_v50 }
 0x527   :  { %2314 = vmatpush1.msk.msra.mxu1 %vm147_vm1, %v2745_v2  ;;  %v1909_v23 = vpop.permute.xlu1 %1908  ;;  %1796 = vmatprep.mubr.f32.mxu1 %v2426_v0  ;;  %v1144_v55 = vadd.f32 %v1139_v51, %v1038_v14 }
 0x528   :  { %v1911_v26 = vpop.permute.xlu0 %1910  ;;  %2318 = vmatprep.subr.msk.mxu0 %vm147_vm1, %v1824_v13  ;;  %v1145_v56 = vadd.f32 %v1141_v53, %v1039_v52 }
 0x529   :  { %v1912_v27 = vsel %vm832_vm9, %v1909_v23, %v1911_v26  ;;  %v1913_v2 = vsel %vm832_vm9, %v1911_v26, %v1909_v23  ;;  %2319 = vmatpush1.msk.msra.mxu0 %vm147_vm1, %v1823_v12 }
 0x52a   :  { %v1926_v29 = vmul.f32 %v1919_v22, %v1912_v27  ;;  %v1927_v30 = vmul.f32 %v1923_v17, %v1913_v2  ;;  %2315 = vmatmul.mubr.msk.f32.vlgmr.msra.gmra.mxu1 %vm265_vm4, %v2312_v24  ;;  %2320 = vmatmul.mubr.msk.f32.vlgmr.msra.gmra.mxu0 %vm265_vm4, %v2317_v21 }
 0x52b   :  { %v2012_v34 = vpop.permute.xlu1 %2011  ;;  %2002 = vmatprep.mubr.f32.mxu1 %v2426_v0  ;;  %2105 = vmatprep.mubr.f32.mxu0 %v2426_v0 }
 0x52c   :  { %v2014_v10 = vpop.permute.xlu0 %2013  ;;  %2323 = vmatprep.subr.msk.mxu1 %vm147_vm1, %v1927_v30 }
 0x52d   :  { %v2015_v37 = vsel %vm938_vm3, %v2012_v34, %v2014_v10  ;;  %v2016_v38 = vsel %vm938_vm3, %v2014_v10, %v2012_v34  ;;  %2324 = vmatpush1.msk.msra.mxu1 %vm147_vm1, %v1926_v29 }
 0x52e   :  { %v2029_v39 = vmul.f32 %v2022_v28, %v2015_v37  ;;  %v2030_v40 = vmul.f32 %v2026_v31, %v2016_v38  ;;  %2325 = vmatmul.mubr.msk.f32.vlgmr.msra.gmra.mxu1 %vm265_vm4, %v2322_v11 }
 0x52f   :  { %v2115_v45 = vpop.permute.xlu1 %2114  ;;  %2208 = vmatprep.mubr.f32.mxu1 %v2426_v0  ;;  %v2332_v0 = vld [vmem:[%s2931_s5 + $0x10] sm:$0x3]  ;;  %s2436_s5 = smov [#allocation5]  }
 0x530   :  { %v2117_v48 = vpop.permute.xlu0 %2116  ;;  %2328 = vmatprep.subr.msk.mxu0 %vm147_vm1, %v2030_v40  ;;  %s2237_s1 = sshll.u32 %s2436_s5, 4  ;;  %s2238_s1 = int_to_ptr.vmem [resolvable:$true] %s2237_s1 }
 0x531   :  { %v2118_v15 = vsel %vm1044_vm10, %v2115_v45, %v2117_v48  ;;  %v2119_v16 = vsel %vm1044_vm10, %v2117_v48, %v2115_v45  ;;  %2329 = vmatpush1.msk.msra.mxu0 %vm147_vm1, %v2029_v39  ;;  %s2399_s14 = scalar_lea.vmem %s2238_s1, 128  ;;  %p2404_p6 = scmp.lt.s32.totalorder %s2238_s1, %s2238_s1 }
 0x532   :  { %v2132_v58 = vmul.f32 %v2125_v41, %v2118_v15  ;;  %v2133_v59 = vmul.f32 %v2129_v42, %v2119_v16  ;;  %2330 = vmatmul.mubr.msk.f32.vlgmr.msra.gmra.mxu0 %vm265_vm4, %v2327_v46  ;;  %p2400_p5 = scmp.ne.s32.totalorder %s2238_s1, %s2399_s14  ;;  %p2405_p7 = scmp.lt.s32.totalorder %s2399_s14, %s2399_s14 }
 0x534   :  { %2333 = vmatprep.subr.msk.mxu1 %vm147_vm1, %v2133_v59  ;;  %p2406_p8 = por %p2405_p7, %p2404_p6 }
 0x535   :  { %2334 = vmatpush1.msk.msra.mxu1 %vm147_vm1, %v2132_v58 }
 0x536   :  { %2335 = vmatmul.mubr.msk.f32.vlgmr.msra.gmra.mxu1 %vm265_vm4, %v2332_v0  ;;  %p2407_p9 = pnand %p2406_p8, %p2400_p5 }
 0x53c   :  { %v1149_v1 = vpop.permute.xlu1 %1148 }
 0x53d   :  { %v1151_v57 = vadd.f32 %v1149_v1, %v1144_v55  ;;  %v1152_v3 = vadd.f32 %v1149_v1, %v1145_v56 }
 0x53f   :  { %v1155_v63 = vcombine.low %v1151_v57, %v1152_v3 }
 0x541   :  { %2292 = vst.sshfl [vmem:[#allocation5] sm:$0x33 pattern:$0x76325410] %v1155_v63 }
 0x5da   :  { %v1431_v54 = vpop.f32.mrf.mxu1 }
 0x5dc   :  { %v1433_v62 = vpop.f32.mrf.mxu1 }
 0x5de   :  { %v1511_v4 = vpop.f32.mrf.mxu1 }
 0x5df   :  { %v1512_v8 = vadd.f32 %v1511_v4, %v1431_v54 }
 0x5e0   :  { %v1513_v5 = vpop.f32.mrf.mxu1 }
 0x5e1   :  { %v1514_v22 = vadd.f32 %v1513_v5, %v1433_v62 }
 0x5e2   :  { %v1612_v6 = vpop.f32.mrf.mxu1 }
 0x5e3   :  { %v1617_v60 = vadd.f32 %v1612_v6, %v1512_v8 }
 0x5e4   :  { %v1614_v7 = vpop.f32.mrf.mxu1 }
 0x5e5   :  { %v1618_v61 = vadd.f32 %v1614_v7, %v1514_v22 }
 0x5e6   :  { %v1715_v9 = vpop.f32.mrf.mxu1 }
 0x5e7   :  { %v1720_v13 = vadd.f32 %v1715_v9, %v1617_v60 }
 0x5e8   :  { %v1717_v12 = vpop.f32.mrf.mxu1 }
 0x5e9   :  { %v1721_v19 = vadd.f32 %v1717_v12, %v1618_v61 }
 0x5ea   :  { %v1798_v17 = vpop.f32.mrf.mxu1  ;;  %v1901_v18 = vpop.f32.mrf.mxu0 }
 0x5eb   :  { %v1803_v20 = vadd.f32 %v1798_v17, %v1720_v13 }
 0x5ec   :  { %v1800_v23 = vpop.f32.mrf.mxu1  ;;  %v1903_v21 = vpop.f32.mrf.mxu0 }
 0x5ed   :  { %v1804_v24 = vadd.f32 %v1800_v23, %v1721_v19  ;;  %v1906_v26 = vadd.f32 %v1901_v18, %v1803_v20 }
 0x5ee   :  { %v2004_v25 = vpop.f32.mrf.mxu1 }
 0x5ef   :  { %v1907_v27 = vadd.f32 %v1903_v21, %v1804_v24  ;;  %v2009_v29 = vadd.f32 %v2004_v25, %v1906_v26 }
 0x5f0   :  { %v2006_v2 = vpop.f32.mrf.mxu1 }
 0x5f1   :  { %v2010_v31 = vadd.f32 %v2006_v2, %v1907_v27 }
 0x5f2   :  { %v2107_v28 = vpop.f32.mrf.mxu0 }
 0x5f3   :  { %v2112_v32 = vadd.f32 %v2107_v28, %v2009_v29 }
 0x5f4   :  { %v2109_v30 = vpop.f32.mrf.mxu0 }
 0x5f5   :  { %v2113_v34 = vadd.f32 %v2109_v30, %v2010_v31 }
 0x5f6   :  { %v2210_v33 = vpop.f32.mrf.mxu1 }
 0x5f7   :  { %v2215_v11 = vadd.f32 %v2210_v33, %v2112_v32 }
 0x5f8   :  { %v2212_v35 = vpop.f32.mrf.mxu1 }
 0x5f9   :  { %v2216_v36 = vadd.f32 %v2212_v35, %v2113_v34  ;;  %v2217_v10 = vadd.f32 %v2215_v11, %v1149_v1 }
 0x5fb   :  { %v2218_v37 = vadd.f32 %v2216_v36, %v1149_v1 }
 0x5fd   :  { %v2221_v38 = vcombine.low %v2217_v10, %v2218_v37 }
 0x5ff   :  { %2336 = vst.sshfl [vmem:[#allocation5 + $0x4] sm:$0x33 pattern:$0x76325410] %v2221_v38 }
 0x600   :  { %2410 = shalt.err (!%p2407_p9)
}
 0x601   :  { %s2437_s15 = smov 64   ;;  %s2438_s12 = smov 4  }
 0x602   :  { %2243 = dma.vmem_to_hbm [thread:$0]  %s2238_s1, 128, %s2934_s8, [#allocation4], %s2437_s15, %s2437_s15, %s2438_s12  }
 0x603   :  { %2421 = dma.done.wait [#allocation4], 128  }
 0x604   :  { %2422 = vsyncadd [#allocation4], 4294967168 }
 0x605   :  { %2247 = vsyncpa [#allocation3], 1 }
 0x606   :  { %2248 = vsyncpa [#allocation4], 1 }

</bundles_post_ra>
